<compile_context>
chip_gen: v7x
topology: tpu7x:2x2x1
jax: 0.10.0
libtpu: 0.0.40
codegen_flags: <defaults>
</compile_context>

<pallas_src>
import numpy as np
import jax
import jax.numpy as jnp
from jax.experimental import pallas as pl
from jax.experimental.pallas import tpu as pltpu


# ------------------------------- fused kernel --------------------------------
def fused_kernel(x_ref, wb_ref, bc_ref, w1_ref, b1_ref, w2_ref, b2_ref, o_ref,
                 band_ref, pooled_ref):
    """One batch image: Conv(3x3,p=1)+ReLU+MaxPool(2,2) -> FC(512,64)+ReLU -> FC(64,10).

    x_ref      : [Ho, 2*W*Cin]      row ho holds image rows 2*ho, 2*ho+1 (channels-last)
    wb_ref     : [4, 4*W*Cin, Wo*Co] banded conv weights, one per 2x2 pool parity (dh,dw)
    bc_ref     : [1, Wo*Co]          conv bias tiled over wo
    w1_ref     : [Ho, Wo*Co, D2]     fc1 weight regrouped by pooled row ho
    b1_ref     : [1, D2];  w2_ref: [D2, D3];  b2_ref: [1, D3];  o_ref: [1, 1, D3]
    band_ref   : VMEM [Ho, 4*W*Cin]  scratch (in-kernel im2col + zero padding)
    pooled_ref : VMEM [Ho, Wo*Co]    scratch (post conv+relu+pool features)
    """
    ho_n = x_ref.shape[0]                  # Ho = 8
    row = x_ref.shape[1] // 2              # W*Cin = 64 (one image row, channels-last)

    # ---- in-kernel im2col: band row ho = padded image rows 2*ho-1 .. 2*ho+2 ----
    band_ref[...] = jnp.zeros_like(band_ref)                        # h zero-padding
    band_ref[:, 1 * row:2 * row] = x_ref[:, 0:row]                  # image row 2*ho
    band_ref[:, 2 * row:3 * row] = x_ref[:, row:2 * row]            # image row 2*ho+1
    band_ref[1:ho_n, 0:row] = x_ref[0:ho_n - 1, row:2 * row]        # image row 2*ho-1
    band_ref[0:ho_n - 1, 3 * row:4 * row] = x_ref[1:ho_n, 0:row]    # image row 2*ho+2
    band = band_ref[...]

    # ---- Conv2d + ReLU + MaxPool2d(2,2): 4 parity matmuls, max in registers ----
    p00 = jnp.dot(band, wb_ref[0], preferred_element_type=jnp.float32)
    p01 = jnp.dot(band, wb_ref[1], preferred_element_type=jnp.float32)
    p10 = jnp.dot(band, wb_ref[2], preferred_element_type=jnp.float32)
    p11 = jnp.dot(band, wb_ref[3], preferred_element_type=jnp.float32)
    pooled = jnp.maximum(jnp.maximum(p00, p01), jnp.maximum(p10, p11))
    pooled = jnp.maximum(pooled + bc_ref[...], 0.0)   # bias + ReLU commute with the max
    pooled_ref[...] = pooled                          # [Ho, Wo*Co]; row=ho, lane=wo*Co+co

    # ---- fcn1: contract the pooled ho rows on the sublane axis (grouped matmul) ----
    h1 = jnp.zeros((1, w1_ref.shape[2]), jnp.float32)
    for ho in range(ho_n):
        h1 = h1 + jnp.dot(pooled_ref[pl.ds(ho, 1), :], w1_ref[ho],
                          preferred_element_type=jnp.float32)
    # TODO(synk): Dropout(p=0.7) is the identity in eval mode; training mode would need
    # a pltpu.prng_seed/prng_random_bits mask with 1/(1-p) scaling.
    h1 = jnp.maximum(h1 + b1_ref[...], 0.0)           # params['ACTIVATION'] == 'ReLU'

    # ---- fcn2 -------------------------------------------------------------------
    o_ref[...] = (jnp.dot(h1, w2_ref[...], preferred_element_type=jnp.float32)
                  + b2_ref[...])[None]


# --------------------------- forward (host wrapper) ---------------------------
def conv_model_forward(x_nhwc, kp):
    """x_nhwc: [B, H, W, Cin] (the torch forward receives NHWC and permutes to NCHW)."""
    B, H, W, Cin = x_nhwc.shape
    Ho, Wo = H // 2, W // 2
    Co = kp['bconv'].shape[-1] // Wo
    D3 = kp['b2'].shape[-1]

    # only per-call host glue: a free reshape -> rows=(b, ho), lanes=(h%2, w, cin)
    x2d = x_nhwc.reshape(B * Ho, 2 * W * Cin)

    out = pl.pallas_call(
        fused_kernel,
        out_shape=jax.ShapeDtypeStruct((B, 1, D3), jnp.float32),
        grid_spec=pltpu.PrefetchScalarGridSpec(
            num_scalar_prefetch=0,
            grid=(B,),
            in_specs=[
                pl.BlockSpec((Ho, 2 * W * Cin), lambda b: (b, 0)),     # one image / program
                pl.BlockSpec(kp['wband'].shape, lambda b: (0, 0, 0)),  # weights stay resident
                pl.BlockSpec(kp['bconv'].shape, lambda b: (0, 0)),
                pl.BlockSpec(kp['w1g'].shape, lambda b: (0, 0, 0)),
                pl.BlockSpec(kp['b1'].shape, lambda b: (0, 0)),
                pl.BlockSpec(kp['w2'].shape, lambda b: (0, 0)),
                pl.BlockSpec(kp['b2'].shape, lambda b: (0, 0)),
            ],
            out_specs=pl.BlockSpec((1, 1, D3), lambda b: (b, 0, 0)),
            scratch_shapes=[
                pltpu.VMEM((Ho, 4 * W * Cin), jnp.float32),   # band   [8, 256]
                pltpu.VMEM((Ho, Wo * Co), jnp.float32),       # pooled [8, 64]
            ],
        ),
        compiler_params=pltpu.CompilerParams(
            dimension_semantics=("parallel",)),               # batch across TensorCores
    )(x2d, kp['wband'], kp['bconv'], kp['w1g'], kp['b1'], kp['w2'], kp['b2'])
    return out.reshape(B, D3)


# --------------------- init-time weight re-layout (hoisted) -------------------
def prepare_kernel_params(params, H=16, W=16):
    conv_w = np.asarray(params['conv_w'], np.float32)   # [Co, Ci, K, K] (torch layout)
    conv_b = np.asarray(params['conv_b'], np.float32)
    fc1_w = np.asarray(params['fc1_w'], np.float32)     # [D2, D1]
    fc1_b = np.asarray(params['fc1_b'], np.float32)
    fc2_w = np.asarray(params['fc2_w'], np.float32)     # [D3, D2]
    fc2_b = np.asarray(params['fc2_b'], np.float32)
    Co, Ci, K, _ = conv_w.shape
    Ho, Wo = H // 2, W // 2
    D2 = fc1_w.shape[0]

    # Banded conv+pool weight: band lane (pr*W*Ci + wi*Ci + ci) holds the padded image
    # value at (row 2*ho + pr - 1, col wi, channel ci). Conv output at
    # (h=2*ho+dh, w=2*wo+dw, co) = sum_{kh,kw,ci} x[2ho+dh+kh-1, 2wo+dw+kw-1, ci]*W[co,ci,kh,kw]
    # -> weight row pr=dh+kh, wi=2*wo+dw+kw-1 (out-of-range wi == zero padding -> skipped).
    wband = np.zeros((4, 4 * W * Ci, Wo * Co), np.float32)
    for dh in range(2):
        for dw in range(2):
            p = dh * 2 + dw
            for kh in range(K):
                pr = dh + kh
                for wo in range(Wo):
                    for kw in range(K):
                        wi = 2 * wo + dw + kw - 1
                        if not 0 <= wi < W:
                            continue
                        r0 = pr * W * Ci + wi * Ci
                        wband[p, r0:r0 + Ci, wo * Co:(wo + 1) * Co] = conv_w[:, :, kh, kw].T
    bconv = np.tile(conv_b, Wo)[None, :]                 # [1, Wo*Co]

    # fc1 regrouped by pooled row ho; torch flattens pooled NCHW as (co, ho, wo):
    #   w1g[ho, wo*Co + co, d] = fc1_w[d, co*Ho*Wo + ho*Wo + wo]
    w1g = (fc1_w.reshape(D2, Co, Ho, Wo).transpose(2, 3, 1, 0).reshape(Ho, Wo * Co, D2))

    return dict(wband=jnp.asarray(wband), bconv=jnp.asarray(bconv),
                w1g=jnp.asarray(w1g), b1=jnp.asarray(fc1_b[None, :]),
                w2=jnp.asarray(fc2_w.T), b2=jnp.asarray(fc2_b[None, :]))


# --------------------------- deterministic init --------------------------------
def _xavier_uniform(key, shape, fan_in, fan_out, gain=np.sqrt(2.0)):
    bound = gain * np.sqrt(6.0 / (fan_in + fan_out))
    return jax.random.uniform(key, shape, jnp.float32, -bound, bound)


def init_params(key, Cin=4, Cout=8, K=3, D1=512, D2=64, D3=10):
    k = jax.random.split(key, 6)
    conv_fan_in, conv_fan_out = Cin * K * K, Cout * K * K
    conv_w = _xavier_uniform(k[0], (Cout, Cin, K, K), conv_fan_in, conv_fan_out)
    conv_b = jax.random.uniform(k[1], (Cout,), jnp.float32,
                                -1.0 / np.sqrt(conv_fan_in), 1.0 / np.sqrt(conv_fan_in))
    fc1_w = _xavier_uniform(k[2], (D2, D1), D1, D2)
    fc1_b = jax.random.uniform(k[3], (D2,), jnp.float32,
                               -1.0 / np.sqrt(D1), 1.0 / np.sqrt(D1))
    fc2_w = _xavier_uniform(k[4], (D3, D2), D2, D3)
    fc2_b = jax.random.uniform(k[5], (D3,), jnp.float32,
                               -1.0 / np.sqrt(D2), 1.0 / np.sqrt(D2))
    return dict(conv_w=conv_w, conv_b=conv_b,
                fc1_w=fc1_w, fc1_b=fc1_b, fc2_w=fc2_w, fc2_b=fc2_b)


# ------------------------- float64 NumPy reference -----------------------------
def reference_forward_np(x_nhwc, params):
    """Exact float64 replica of the PyTorch ConvModel forward (eval mode)."""
    x = np.asarray(x_nhwc, np.float64)                       # [B, H, W, Cin]
    w = np.asarray(params['conv_w'], np.float64)             # [Co, Ci, K, K]
    B, H, W, _ = x.shape
    K = w.shape[-1]
    xp = np.pad(x, ((0, 0), (1, 1), (1, 1), (0, 0)))
    conv = np.zeros((B, H, W, w.shape[0]), np.float64)
    for kh in range(K):
        for kw in range(K):
            conv += np.einsum('bhwc,oc->bhwo', xp[:, kh:kh + H, kw:kw + W, :], w[:, :, kh, kw])
    conv = np.maximum(conv + np.asarray(params['conv_b'], np.float64), 0.0)
    pooled = conv.reshape(B, H // 2, 2, W // 2, 2, -1).max(axis=(2, 4))   # [B,Ho,Wo,Co]
    feats = pooled.transpose(0, 3, 1, 2).reshape(B, -1)                   # torch NCHW flatten
    h = np.maximum(feats @ np.asarray(params['fc1_w'], np.float64).T
                   + np.asarray(params['fc1_b'], np.float64), 0.0)
    return h @ np.asarray(params['fc2_w'], np.float64).T + np.asarray(params['fc2_b'], np.float64)


# ----------------------------------- main ---------------------------------------
if __name__ == "__main__":
    key = jax.random.PRNGKey(0)
    pkey, xkey = jax.random.split(key)
    params = init_params(pkey)
    kparams = prepare_kernel_params(params)                   # init-time weight re-layout
    x = jax.random.normal(xkey, (2, 16, 16, 4), jnp.float32)  # NHWC model input

    fwd = jax.jit(lambda inp: conv_model_forward(inp, kparams))
    out = fwd(x)
    jax.block_until_ready(out)
    assert out.shape == (2, 10) and out.dtype == jnp.float32

    ref = reference_forward_np(np.asarray(x), {k: np.asarray(v) for k, v in params.items()})
    np.testing.assert_allclose(np.asarray(out), ref, rtol=1e-1, atol=1e-1)
    print("KERNEL_OK")
</pallas_src>

<mosaic_0001>
module attributes {stable_mosaic.version = 11 : i64} {
  func.func @fused_kernel(%arg0: i32, %arg1: memref<8x128xf32, #tpu.memory_space<vmem>>, %arg2: memref<4x256x64xf32, #tpu.memory_space<vmem>>, %arg3: memref<1x64xf32, #tpu.memory_space<vmem>>, %arg4: memref<8x64x64xf32, #tpu.memory_space<vmem>>, %arg5: memref<1x64xf32, #tpu.memory_space<vmem>>, %arg6: memref<64x10xf32, #tpu.memory_space<vmem>>, %arg7: memref<1x10xf32, #tpu.memory_space<vmem>>, %arg8: memref<1x1x10xf32, #tpu.memory_space<vmem>>, %arg9: memref<8x256xf32, #tpu.memory_space<vmem>>, %arg10: memref<8x64xf32, #tpu.memory_space<vmem>>) attributes {dimension_semantics = [#tpu.dimension_semantics<parallel>], iteration_bounds = array<i64: 2>, scalar_prefetch = 0 : i64, scratch_operands = 2 : i64, tpu.core_type = #tpu.core_type<tc>, window_params = [{transform_indices = @transform_0, window_bounds = array<i64: 8, 128>}, {pipeline_mode = #tpu.pipeline_mode<synchronous>, transform_indices = @transform_1, window_bounds = array<i64: 4, 256, 64>}, {pipeline_mode = #tpu.pipeline_mode<synchronous>, transform_indices = @transform_2, window_bounds = array<i64: 1, 64>}, {pipeline_mode = #tpu.pipeline_mode<synchronous>, transform_indices = @transform_3, window_bounds = array<i64: 8, 64, 64>}, {pipeline_mode = #tpu.pipeline_mode<synchronous>, transform_indices = @transform_4, window_bounds = array<i64: 1, 64>}, {pipeline_mode = #tpu.pipeline_mode<synchronous>, transform_indices = @transform_5, window_bounds = array<i64: 64, 10>}, {pipeline_mode = #tpu.pipeline_mode<synchronous>, transform_indices = @transform_6, window_bounds = array<i64: 1, 10>}, {transform_indices = @transform_7, window_bounds = array<i64: 1, 1, 10>}]} {
    %cst = arith.constant 0.000000e+00 : f32
    %0 = vector.broadcast %cst : f32 to vector<8x256xf32>
    %c0 = arith.constant 0 : index
    %c0_0 = arith.constant 0 : index
    %1 = vector.load %arg9[%c0, %c0_0] : memref<8x256xf32, #tpu.memory_space<vmem>>, vector<8x256xf32>
    tpu.vector_store %arg9[%c0, %c0_0], %0 {strides = array<i32>} : memref<8x256xf32, #tpu.memory_space<vmem>>, vector<8x256xf32>,
    %c0_1 = arith.constant 0 : index
    %c0_2 = arith.constant 0 : index
    %2 = vector.load %arg1[%c0_1, %c0_2] : memref<8x128xf32, #tpu.memory_space<vmem>>, vector<8x64xf32>
    %c0_3 = arith.constant 0 : index
    %c64 = arith.constant 64 : index
    %3 = vector.load %arg9[%c0_3, %c64] : memref<8x256xf32, #tpu.memory_space<vmem>>, vector<8x64xf32>
    tpu.vector_store %arg9[%c0_3, %c64], %2 {strides = array<i32>} : memref<8x256xf32, #tpu.memory_space<vmem>>, vector<8x64xf32>,
    %c0_4 = arith.constant 0 : index
    %c64_5 = arith.constant 64 : index
    %4 = vector.load %arg1[%c0_4, %c64_5] : memref<8x128xf32, #tpu.memory_space<vmem>>, vector<8x64xf32>
    %c0_6 = arith.constant 0 : index
    %c128 = arith.constant 128 : index
    %5 = vector.load %arg9[%c0_6, %c128] : memref<8x256xf32, #tpu.memory_space<vmem>>, vector<8x64xf32>
    tpu.vector_store %arg9[%c0_6, %c128], %4 {strides = array<i32>} : memref<8x256xf32, #tpu.memory_space<vmem>>, vector<8x64xf32>,
    %c0_7 = arith.constant 0 : index
    %c64_8 = arith.constant 64 : index
    %6 = vector.load %arg1[%c0_7, %c64_8] : memref<8x128xf32, #tpu.memory_space<vmem>>, vector<7x64xf32>
    %c1 = arith.constant 1 : index
    %c0_9 = arith.constant 0 : index
    %7 = vector.load %arg9[%c1, %c0_9] : memref<8x256xf32, #tpu.memory_space<vmem>>, vector<7x64xf32>
    tpu.vector_store %arg9[%c1, %c0_9], %6 {strides = array<i32>} : memref<8x256xf32, #tpu.memory_space<vmem>>, vector<7x64xf32>,
    %c1_10 = arith.constant 1 : index
    %c0_11 = arith.constant 0 : index
    %8 = vector.load %arg1[%c1_10, %c0_11] : memref<8x128xf32, #tpu.memory_space<vmem>>, vector<7x64xf32>
    %c0_12 = arith.constant 0 : index
    %c192 = arith.constant 192 : index
    %9 = vector.load %arg9[%c0_12, %c192] : memref<8x256xf32, #tpu.memory_space<vmem>>, vector<7x64xf32>
    tpu.vector_store %arg9[%c0_12, %c192], %8 {strides = array<i32>} : memref<8x256xf32, #tpu.memory_space<vmem>>, vector<7x64xf32>,
    %c0_13 = arith.constant 0 : index
    %c0_14 = arith.constant 0 : index
    %10 = vector.load %arg9[%c0_13, %c0_14] : memref<8x256xf32, #tpu.memory_space<vmem>>, vector<8x256xf32>
    %c0_15 = arith.constant 0 : index
    %c0_16 = arith.constant 0 : index
    %c0_17 = arith.constant 0 : index
    %11 = vector.load %arg2[%c0_15, %c0_16, %c0_17] : memref<4x256x64xf32, #tpu.memory_space<vmem>>, vector<1x256x64xf32>
    %12 = vector.shape_cast %11 : vector<1x256x64xf32> to vector<256x64xf32>
    %cst_18 = arith.constant dense<0.000000e+00> : vector<8x64xf32>
    %13 = tpu.matmul %10, %12, %cst_18 {dimension_numbers = #tpu.dot_dimension_numbers<[1], [0], [0], [1], [0, 0, 1, 1], [], []>} : vector<8x256xf32>, vector<256x64xf32>, vector<8x64xf32> -> vector<8x64xf32>
    %c1_19 = arith.constant 1 : index
    %c0_20 = arith.constant 0 : index
    %c0_21 = arith.constant 0 : index
    %14 = vector.load %arg2[%c1_19, %c0_20, %c0_21] : memref<4x256x64xf32, #tpu.memory_space<vmem>>, vector<1x256x64xf32>
    %15 = vector.shape_cast %14 : vector<1x256x64xf32> to vector<256x64xf32>
    %cst_22 = arith.constant dense<0.000000e+00> : vector<8x64xf32>
    %16 = tpu.matmul %10, %15, %cst_22 {dimension_numbers = #tpu.dot_dimension_numbers<[1], [0], [0], [1], [0, 0, 1, 1], [], []>} : vector<8x256xf32>, vector<256x64xf32>, vector<8x64xf32> -> vector<8x64xf32>
    %c2 = arith.constant 2 : index
    %c0_23 = arith.constant 0 : index
    %c0_24 = arith.constant 0 : index
    %17 = vector.load %arg2[%c2, %c0_23, %c0_24] : memref<4x256x64xf32, #tpu.memory_space<vmem>>, vector<1x256x64xf32>
    %18 = vector.shape_cast %17 : vector<1x256x64xf32> to vector<256x64xf32>
    %cst_25 = arith.constant dense<0.000000e+00> : vector<8x64xf32>
    %19 = tpu.matmul %10, %18, %cst_25 {dimension_numbers = #tpu.dot_dimension_numbers<[1], [0], [0], [1], [0, 0, 1, 1], [], []>} : vector<8x256xf32>, vector<256x64xf32>, vector<8x64xf32> -> vector<8x64xf32>
    %c3 = arith.constant 3 : index
    %c0_26 = arith.constant 0 : index
    %c0_27 = arith.constant 0 : index
    %20 = vector.load %arg2[%c3, %c0_26, %c0_27] : memref<4x256x64xf32, #tpu.memory_space<vmem>>, vector<1x256x64xf32>
    %21 = vector.shape_cast %20 : vector<1x256x64xf32> to vector<256x64xf32>
    %cst_28 = arith.constant dense<0.000000e+00> : vector<8x64xf32>
    %22 = tpu.matmul %10, %21, %cst_28 {dimension_numbers = #tpu.dot_dimension_numbers<[1], [0], [0], [1], [0, 0, 1, 1], [], []>} : vector<8x256xf32>, vector<256x64xf32>, vector<8x64xf32> -> vector<8x64xf32>
    %23 = arith.maximumf %13, %16 : vector<8x64xf32>
    %24 = arith.maximumf %19, %22 : vector<8x64xf32>
    %25 = arith.maximumf %23, %24 : vector<8x64xf32>
    %c0_29 = arith.constant 0 : index
    %c0_30 = arith.constant 0 : index
    %26 = vector.load %arg3[%c0_29, %c0_30] : memref<1x64xf32, #tpu.memory_space<vmem>>, vector<1x64xf32>
    %27 = vector.broadcast %26 : vector<1x64xf32> to vector<8x64xf32>
    %28 = arith.addf %25, %27 : vector<8x64xf32>
    %cst_31 = arith.constant 0.000000e+00 : f32
    %29 = vector.broadcast %cst_31 : f32 to vector<8x64xf32>
    %30 = arith.maximumf %28, %29 : vector<8x64xf32>
    %c0_32 = arith.constant 0 : index
    %c0_33 = arith.constant 0 : index
    %31 = vector.load %arg10[%c0_32, %c0_33] : memref<8x64xf32, #tpu.memory_space<vmem>>, vector<8x64xf32>
    tpu.vector_store %arg10[%c0_32, %c0_33], %30 {strides = array<i32>} : memref<8x64xf32, #tpu.memory_space<vmem>>, vector<8x64xf32>,
    %cst_34 = arith.constant 0.000000e+00 : f32
    %32 = vector.broadcast %cst_34 : f32 to vector<1x64xf32>
    %c0_35 = arith.constant 0 : index
    %c0_36 = arith.constant 0 : index
    %33 = vector.load %arg10[%c0_35, %c0_36] : memref<8x64xf32, #tpu.memory_space<vmem>>, vector<1x64xf32>
    %c0_37 = arith.constant 0 : index
    %c0_38 = arith.constant 0 : index
    %c0_39 = arith.constant 0 : index
    %34 = vector.load %arg4[%c0_37, %c0_38, %c0_39] : memref<8x64x64xf32, #tpu.memory_space<vmem>>, vector<1x64x64xf32>
    %35 = vector.shape_cast %34 : vector<1x64x64xf32> to vector<64x64xf32>
    %cst_40 = arith.constant dense<0.000000e+00> : vector<1x64xf32>
    %36 = tpu.matmul %33, %35, %cst_40 {dimension_numbers = #tpu.dot_dimension_numbers<[1], [0], [0], [1], [0, 0, 1, 1], [], []>} : vector<1x64xf32>, vector<64x64xf32>, vector<1x64xf32> -> vector<1x64xf32>
    %37 = arith.addf %32, %36 : vector<1x64xf32>
    %c1_41 = arith.constant 1 : index
    %c0_42 = arith.constant 0 : index
    %38 = vector.load %arg10[%c1_41, %c0_42] : memref<8x64xf32, #tpu.memory_space<vmem>>, vector<1x64xf32>
    %c1_43 = arith.constant 1 : index
    %c0_44 = arith.constant 0 : index
    %c0_45 = arith.constant 0 : index
    %39 = vector.load %arg4[%c1_43, %c0_44, %c0_45] : memref<8x64x64xf32, #tpu.memory_space<vmem>>, vector<1x64x64xf32>
    %40 = vector.shape_cast %39 : vector<1x64x64xf32> to vector<64x64xf32>
    %cst_46 = arith.constant dense<0.000000e+00> : vector<1x64xf32>
    %41 = tpu.matmul %38, %40, %cst_46 {dimension_numbers = #tpu.dot_dimension_numbers<[1], [0], [0], [1], [0, 0, 1, 1], [], []>} : vector<1x64xf32>, vector<64x64xf32>, vector<1x64xf32> -> vector<1x64xf32>
    %42 = arith.addf %37, %41 : vector<1x64xf32>
    %c2_47 = arith.constant 2 : index
    %c0_48 = arith.constant 0 : index
    %43 = vector.load %arg10[%c2_47, %c0_48] : memref<8x64xf32, #tpu.memory_space<vmem>>, vector<1x64xf32>
    %c2_49 = arith.constant 2 : index
    %c0_50 = arith.constant 0 : index
    %c0_51 = arith.constant 0 : index
    %44 = vector.load %arg4[%c2_49, %c0_50, %c0_51] : memref<8x64x64xf32, #tpu.memory_space<vmem>>, vector<1x64x64xf32>
    %45 = vector.shape_cast %44 : vector<1x64x64xf32> to vector<64x64xf32>
    %cst_52 = arith.constant dense<0.000000e+00> : vector<1x64xf32>
    %46 = tpu.matmul %43, %45, %cst_52 {dimension_numbers = #tpu.dot_dimension_numbers<[1], [0], [0], [1], [0, 0, 1, 1], [], []>} : vector<1x64xf32>, vector<64x64xf32>, vector<1x64xf32> -> vector<1x64xf32>
    %47 = arith.addf %42, %46 : vector<1x64xf32>
    %c3_53 = arith.constant 3 : index
    %c0_54 = arith.constant 0 : index
    %48 = vector.load %arg10[%c3_53, %c0_54] : memref<8x64xf32, #tpu.memory_space<vmem>>, vector<1x64xf32>
    %c3_55 = arith.constant 3 : index
    %c0_56 = arith.constant 0 : index
    %c0_57 = arith.constant 0 : index
    %49 = vector.load %arg4[%c3_55, %c0_56, %c0_57] : memref<8x64x64xf32, #tpu.memory_space<vmem>>, vector<1x64x64xf32>
    %50 = vector.shape_cast %49 : vector<1x64x64xf32> to vector<64x64xf32>
    %cst_58 = arith.constant dense<0.000000e+00> : vector<1x64xf32>
    %51 = tpu.matmul %48, %50, %cst_58 {dimension_numbers = #tpu.dot_dimension_numbers<[1], [0], [0], [1], [0, 0, 1, 1], [], []>} : vector<1x64xf32>, vector<64x64xf32>, vector<1x64xf32> -> vector<1x64xf32>
    %52 = arith.addf %47, %51 : vector<1x64xf32>
    %c4 = arith.constant 4 : index
    %c0_59 = arith.constant 0 : index
    %53 = vector.load %arg10[%c4, %c0_59] : memref<8x64xf32, #tpu.memory_space<vmem>>, vector<1x64xf32>
    %c4_60 = arith.constant 4 : index
    %c0_61 = arith.constant 0 : index
    %c0_62 = arith.constant 0 : index
    %54 = vector.load %arg4[%c4_60, %c0_61, %c0_62] : memref<8x64x64xf32, #tpu.memory_space<vmem>>, vector<1x64x64xf32>
    %55 = vector.shape_cast %54 : vector<1x64x64xf32> to vector<64x64xf32>
    %cst_63 = arith.constant dense<0.000000e+00> : vector<1x64xf32>
    %56 = tpu.matmul %53, %55, %cst_63 {dimension_numbers = #tpu.dot_dimension_numbers<[1], [0], [0], [1], [0, 0, 1, 1], [], []>} : vector<1x64xf32>, vector<64x64xf32>, vector<1x64xf32> -> vector<1x64xf32>
    %57 = arith.addf %52, %56 : vector<1x64xf32>
    %c5 = arith.constant 5 : index
    %c0_64 = arith.constant 0 : index
    %58 = vector.load %arg10[%c5, %c0_64] : memref<8x64xf32, #tpu.memory_space<vmem>>, vector<1x64xf32>
    %c5_65 = arith.constant 5 : index
    %c0_66 = arith.constant 0 : index
    %c0_67 = arith.constant 0 : index
    %59 = vector.load %arg4[%c5_65, %c0_66, %c0_67] : memref<8x64x64xf32, #tpu.memory_space<vmem>>, vector<1x64x64xf32>
    %60 = vector.shape_cast %59 : vector<1x64x64xf32> to vector<64x64xf32>
    %cst_68 = arith.constant dense<0.000000e+00> : vector<1x64xf32>
    %61 = tpu.matmul %58, %60, %cst_68 {dimension_numbers = #tpu.dot_dimension_numbers<[1], [0], [0], [1], [0, 0, 1, 1], [], []>} : vector<1x64xf32>, vector<64x64xf32>, vector<1x64xf32> -> vector<1x64xf32>
    %62 = arith.addf %57, %61 : vector<1x64xf32>
    %c6 = arith.constant 6 : index
    %c0_69 = arith.constant 0 : index
    %63 = vector.load %arg10[%c6, %c0_69] : memref<8x64xf32, #tpu.memory_space<vmem>>, vector<1x64xf32>
    %c6_70 = arith.constant 6 : index
    %c0_71 = arith.constant 0 : index
    %c0_72 = arith.constant 0 : index
    %64 = vector.load %arg4[%c6_70, %c0_71, %c0_72] : memref<8x64x64xf32, #tpu.memory_space<vmem>>, vector<1x64x64xf32>
    %65 = vector.shape_cast %64 : vector<1x64x64xf32> to vector<64x64xf32>
    %cst_73 = arith.constant dense<0.000000e+00> : vector<1x64xf32>
    %66 = tpu.matmul %63, %65, %cst_73 {dimension_numbers = #tpu.dot_dimension_numbers<[1], [0], [0], [1], [0, 0, 1, 1], [], []>} : vector<1x64xf32>, vector<64x64xf32>, vector<1x64xf32> -> vector<1x64xf32>
    %67 = arith.addf %62, %66 : vector<1x64xf32>
    %c7 = arith.constant 7 : index
    %c0_74 = arith.constant 0 : index
    %68 = vector.load %arg10[%c7, %c0_74] : memref<8x64xf32, #tpu.memory_space<vmem>>, vector<1x64xf32>
    %c7_75 = arith.constant 7 : index
    %c0_76 = arith.constant 0 : index
    %c0_77 = arith.constant 0 : index
    %69 = vector.load %arg4[%c7_75, %c0_76, %c0_77] : memref<8x64x64xf32, #tpu.memory_space<vmem>>, vector<1x64x64xf32>
    %70 = vector.shape_cast %69 : vector<1x64x64xf32> to vector<64x64xf32>
    %cst_78 = arith.constant dense<0.000000e+00> : vector<1x64xf32>
    %71 = tpu.matmul %68, %70, %cst_78 {dimension_numbers = #tpu.dot_dimension_numbers<[1], [0], [0], [1], [0, 0, 1, 1], [], []>} : vector<1x64xf32>, vector<64x64xf32>, vector<1x64xf32> -> vector<1x64xf32>
    %72 = arith.addf %67, %71 : vector<1x64xf32>
    %c0_79 = arith.constant 0 : index
    %c0_80 = arith.constant 0 : index
    %73 = vector.load %arg5[%c0_79, %c0_80] : memref<1x64xf32, #tpu.memory_space<vmem>>, vector<1x64xf32>
    %74 = arith.addf %72, %73 : vector<1x64xf32>
    %cst_81 = arith.constant 0.000000e+00 : f32
    %75 = vector.broadcast %cst_81 : f32 to vector<1x64xf32>
    %76 = arith.maximumf %74, %75 : vector<1x64xf32>
    %c0_82 = arith.constant 0 : index
    %c0_83 = arith.constant 0 : index
    %77 = vector.load %arg6[%c0_82, %c0_83] : memref<64x10xf32, #tpu.memory_space<vmem>>, vector<64x10xf32>
    %cst_84 = arith.constant dense<0.000000e+00> : vector<1x10xf32>
    %78 = tpu.matmul %76, %77, %cst_84 {dimension_numbers = #tpu.dot_dimension_numbers<[1], [0], [0], [1], [0, 0, 1, 1], [], []>} : vector<1x64xf32>, vector<64x10xf32>, vector<1x10xf32> -> vector<1x10xf32>
    %c0_85 = arith.constant 0 : index
    %c0_86 = arith.constant 0 : index
    %79 = vector.load %arg7[%c0_85, %c0_86] : memref<1x10xf32, #tpu.memory_space<vmem>>, vector<1x10xf32>
    %80 = arith.addf %78, %79 : vector<1x10xf32>
    %81 = vector.shape_cast %80 : vector<1x10xf32> to vector<1x1x10xf32>
    %c0_87 = arith.constant 0 : index
    %c0_88 = arith.constant 0 : index
    %c0_89 = arith.constant 0 : index
    %82 = vector.load %arg8[%c0_87, %c0_88, %c0_89] : memref<1x1x10xf32, #tpu.memory_space<vmem>>, vector<1x1x10xf32>
    tpu.vector_store %arg8[%c0_87, %c0_88, %c0_89], %81 {strides = array<i32>} : memref<1x1x10xf32, #tpu.memory_space<vmem>>, vector<1x1x10xf32>,
    return
  }
  func.func @transform_0(%arg0: i32) -> (i32, i32) {
    %c0_i32 = arith.constant 0 : i32
    %c0_i32_0 = arith.constant 0 : i32
    return %arg0, %c0_i32 : i32, i32
  }
  func.func @transform_1(%arg0: i32) -> (i32, i32, i32) {
    %c0_i32 = arith.constant 0 : i32
    %c0_i32_0 = arith.constant 0 : i32
    %c0_i32_1 = arith.constant 0 : i32
    %c0_i32_2 = arith.constant 0 : i32
    return %c0_i32, %c0_i32_0, %c0_i32_1 : i32, i32, i32
  }
  func.func @transform_2(%arg0: i32) -> (i32, i32) {
    %c0_i32 = arith.constant 0 : i32
    %c0_i32_0 = arith.constant 0 : i32
    %c0_i32_1 = arith.constant 0 : i32
    return %c0_i32, %c0_i32_0 : i32, i32
  }
  func.func @transform_3(%arg0: i32) -> (i32, i32, i32) {
    %c0_i32 = arith.constant 0 : i32
    %c0_i32_0 = arith.constant 0 : i32
    %c0_i32_1 = arith.constant 0 : i32
    %c0_i32_2 = arith.constant 0 : i32
    return %c0_i32, %c0_i32_0, %c0_i32_1 : i32, i32, i32
  }
  func.func @transform_4(%arg0: i32) -> (i32, i32) {
    %c0_i32 = arith.constant 0 : i32
    %c0_i32_0 = arith.constant 0 : i32
    %c0_i32_1 = arith.constant 0 : i32
    return %c0_i32, %c0_i32_0 : i32, i32
  }
  func.func @transform_5(%arg0: i32) -> (i32, i32) {
    %c0_i32 = arith.constant 0 : i32
    %c0_i32_0 = arith.constant 0 : i32
    %c0_i32_1 = arith.constant 0 : i32
    return %c0_i32, %c0_i32_0 : i32, i32
  }
  func.func @transform_6(%arg0: i32) -> (i32, i32) {
    %c0_i32 = arith.constant 0 : i32
    %c0_i32_0 = arith.constant 0 : i32
    %c0_i32_1 = arith.constant 0 : i32
    return %c0_i32, %c0_i32_0 : i32, i32
  }
  func.func @transform_7(%arg0: i32) -> (i32, i32, i32) {
    %c0_i32 = arith.constant 0 : i32
    %c0_i32_0 = arith.constant 0 : i32
    %c0_i32_1 = arith.constant 0 : i32
    return %arg0, %c0_i32, %c0_i32_0 : i32, i32, i32
  }
}

</mosaic_0001>

<bundles_post_ra>
// kernel: _lambda_.1
= control target key start
LH: loop header
LB: loop body
LE: loop exit
PB: predicated region body
PF: predicated region fallthrough
CT: control target
= control target key end

     0   :  { %12 = vsyncpa [#allocation5], 0  ;;  %s3150_s0 = inlined_call_operand.vmem [shape: f32[16,128], index: 0, kind: input, shape index: {}]   ;;  %s3151_s1 = inlined_call_operand.vmem [shape: f32[4,256,64], index: 1, kind: input, shape index: {}]   ;;  %s3152_s2 = inlined_call_operand.vmem [shape: f32[1,64], index: 2, kind: input, shape index: {}]   ;;  %s3153_s3 = inlined_call_operand.hbm [shape: f32[8,64,64], index: 3, kind: input, shape index: {}]   ;;  %s3154_s4 = inlined_call_operand.vmem [shape: f32[1,64], index: 4, kind: input, shape index: {}]   ;;  %s3155_s5 = inlined_call_operand.vmem [shape: f32[64,10], index: 5, kind: input, shape index: {}]   ;;  %s3156_s6 = inlined_call_operand.vmem [shape: f32[1,10], index: 6, kind: input, shape index: {}]   ;;  %s3157_s7 = inlined_call_operand.hbm [shape: f32[2,1,10], index: 7, kind: output, shape index: {}]  }
   0x1   :  { %13 = vsyncpa [#allocation6], 0 }
   0x2   :  { %15 = vsyncpa [#allocation6 + $0x1], 0  ;;  %s2525_s24 = smov 0   ;;  %s2527_s25 = smov 0  }
   0x3   :  { %s2529_s26 = smov 0   ;;  %s2531_s27 = smov 0  }
   0x4 LB: > { %s2546_s28 = sadd.s32 4294967295, %s2475_s27   ;;  %s1581_s29 = sadd.s32 4294967294, %s2475_s27   ;;  %s2475_s27 = sphi %s2531_s27, %s3173_s27   ;;  %s2471_s26 = sphi %s2529_s26, %s3172_s26   ;;  %s2467_s25 = sphi %s2527_s25, %s3171_s25   ;;  %s2463_s24 = sphi %s2525_s24, %s3170_s24  }
   0x5   : > { %s2550_s30 = sadd.s32 1, %s2475_s27   ;;  %s180_s8 = sadd.s32 1, %s2471_s26 }
   0x6   : > { %s177_s9 = ssub.s32 %s2475_s27, %s2550_s30  ;;  %p190_p0 = scmp.ne.s32.totalorder %s2471_s26, %s2467_s25 }
   0x7   : > { %p178_p1 = scmp.eq.s32.totalorder %s177_s9, 0  ;;  %p191_p2 = scmp.eq.s32.totalorder %s2546_s28, 1 }
   0x8   : > { %p196_p3 = scmp.ne.s32.totalorder %s2467_s25, %s2463_s24  ;;  %p197_p4 = scmp.eq.s32.totalorder %s1581_s29, 1 }
   0x9   : > { %s2561_s10 = scalar_select %p178_p1, %s2471_s26, %s180_s8  }
   0xa   : > { %p2563_p5 = por %p191_p2, %p190_p0  ;;  %p2567_p6 = por %p197_p4, %p196_p3 }
   0xb   : > { %p1582_p7 = scmp.ge.s32.totalorder %s2475_s27, 1  ;;  %p204_p8 = scmp.lt.s32.totalorder %s2475_s27, 3 }
   0xc   : > { %s3161_s11 = scalar_select %p2563_p5, 1, 0 }
   0xd   : > { %s3162_s12 = scalar_select %p2567_p6, 1, 0 }
   0xe   : > { %p3158_p9 = scmp.eq.s32.totalorder %s2546_s28, 0  ;;  %p2574_p10 = pnand %p1582_p7, %p204_p8 }
   0xf   : > { %s2477_s14 = smov [#allocation4]   ;;  %s2381_s19 = scalar_lea.hbm %s3153_s3, 8192 }
  0x10   : > { %s3163_s13 = scalar_select %p2574_p10, 1, 0 }
  0x11   : > { %s222_s15 = sshll.u32 %s2477_s14, 4  ;;  %p2331_p11 = pneg %p2574_p10  ;;  %s223_s15 = int_to_ptr.vmem [resolvable:$true] %s222_s15 }
  0x12   : > { %p2382_p13 = scmp.ne.s32.totalorder %s3153_s3, %s2381_s19  ;;  %p2388_p3 = scmp.lt.u32.totalorder %s2381_s19, %s3153_s3 }
  0x13   : > { %p2582_p12 = pnand %p3158_p9, %p2331_p11 }
  0x15   : > { %p2383_p0 = pneg %p2582_p12 }
  0x17   : > { %p2384_p1 = pnand %p2383_p0, %p2382_p13 }
  0x19   : > { %p2385_p2 = pneg %p2384_p1 }
  0x1b   : > { %p2390_p4 = pnand %p2388_p3, %p2385_p2 }
  0x1d   : > { %2393 = shalt.err (!%p2390_p4)
}
  0x1e   : > { %s2394_s29 = scalar_lea.vmem %s223_s15, 8192  ;;  %p2402_p9 = scmp.lt.s32.totalorder %s223_s15, %s223_s15 }
  0x1f   : > { %p2395_p7 = scmp.ne.s32.totalorder %s223_s15, %s2394_s29  ;;  %p2403_p6 = scmp.lt.s32.totalorder %s2394_s29, %s2394_s29 }
  0x21   : > { %p2397_p8 = pnand %p2395_p7, %p2383_p0  ;;  %p2404_p5 = por %p2403_p6, %p2402_p9 }
  0x23   : > { %p2398_p11 = pneg %p2397_p8 }
  0x25   : > { %p2405_p10 = pnand %p2404_p5, %p2398_p11 }
  0x27   : > { %2408 = shalt.err (!%p2405_p10)
}
  0x28   : > { %s2478_s8 = smov 128   ;;  %s2479_s9 = smov 8  }
  0x29   : > { %2334 = dma.hbm_to_vmem [thread:$0]  (!%p2582_p12), %s3153_s3, 8192, %s223_s15, [#allocation5], %s2478_s8, %s2478_s8, %s2479_s9  }
  0x2a   : > { %p3165_p13 = scmp.ne.s32.totalorder %s3163_s13, 0 }
  0x2b   : > { %p3166_p1 = scmp.eq.s32.totalorder (!%p3165_p13), %s2546_s28, 0 }
  0x2c   : > { %254 = sbr.rel (%p3165_p13) target bundleno = 946 (0x3b2), region = 48 }
  0x33   : > { %2454 = dma.done.wait (%p3166_p1), [#allocation5], 8192   ;;  %p3167_p0 = pmov %p3166_p1 }
  0x34   : > { %p284_p5 = scmp.lt.s32.totalorder %s2546_s28, 1  ;;  %v2480_v0 = vmov 0.0   ;;  %s2481_s20 = smov 64   ;;  %v337_v5 = vld [vmem:[%s3151_s1 + $0x80] sm:$0xff]  ;;  %v338_v6 = vld [vmem:[%s3151_s1 + $0x88] sm:$0xff]  ;;  %v339_v17 = vld [vmem:[%s3151_s1 + $0x90] sm:$0xff] }
  0x35   : > { %2456 = vsyncadd (%p3167_p0), [#allocation5], 4294959104  ;;  %289 = vst [vmem:[#allocation2 + $0x8] sm:$0xff] %v2480_v0  ;;  %v2089_v7 = vpack.c.bf16 %v338_v6, %v337_v5  ;;  %v1604_v8 = vld [vmem:[%s3151_s1 + $0x180] sm:$0xff]  ;;  %v1605_v9 = vld [vmem:[%s3151_s1 + $0x188] sm:$0xff]  ;;  %vm302_vm0 = vcmask 523264  }
  0x36   : > { %288 = vst [vmem:[#allocation2] sm:$0xff] %v2480_v0  ;;  %s285_s16 = scalar_select %p284_p5, %s2546_s28, 1  ;;  %v321_v10 = vld [vmem:[%s3151_s1] sm:$0xff]  ;;  %v2121_v11 = vpack.c.bf16 %v1605_v9, %v1604_v8  ;;  %v322_v12 = vld [vmem:[%s3151_s1 + $0x8] sm:$0xff]  ;;  %v340_v18 = vld [vmem:[%s3151_s1 + $0x98] sm:$0xff]  ;;  %vm317_vm1 = vcmask 1047040  }
  0x37   : > { %v1588_v13 = vld [vmem:[%s3151_s1 + $0x100] sm:$0xff]  ;;  %v1589_v14 = vld [vmem:[%s3151_s1 + $0x108] sm:$0xff]  ;;  %2090 = vmatprep.subr.bf16.mxu0 %v2089_v7  ;;  %v2091_v15 = vpack.c.bf16 %v322_v12, %v321_v10  ;;  %v1606_v19 = vld [vmem:[%s3151_s1 + $0x190] sm:$0xff]  ;;  %v2093_v20 = vpack.c.bf16 %v340_v18, %v339_v17  ;;  %vm295_vm2 = vcmask 1048064   ;;  %vm310_vm3 = vcmask 523265   ;;  %s282_s19 = sand.u32 1, %s2467_s25  }
  0x38   : > { %s1587_s18 = sshll.u32 %s285_s16, 3  ;;  %v2123_v16 = vpack.c.bf16 %v1589_v14, %v1588_v13  ;;  %v1607_v21 = vld [vmem:[%s3151_s1 + $0x198] sm:$0xff]  ;;  %v323_v22 = vld [vmem:[%s3151_s1 + $0x10] sm:$0xff]  ;;  %2122 = vmatprep.subr.bf16.mxu1 %v2121_v11  ;;  %v341_v29 = vld [vmem:[%s3151_s1 + $0xa0] sm:$0xff]  ;;  %vm2483_vm4 = vmmov 0   ;;  %s1694_s22 = sshll.u32 %s2546_s28, 4 }
  0x39   : > { %s287_s13 = scalar_lea.vmem %s3150_s0, %s1587_s18  ;;  %2092 = vmatpush3.bf16.msra.mxu0 %v2091_v15  ;;  %v2125_v23 = vpack.c.bf16 %v1607_v21, %v1606_v19  ;;  %v324_v24 = vld [vmem:[%s3151_s1 + $0x18] sm:$0xff]  ;;  %v1590_v25 = vld [vmem:[%s3151_s1 + $0x110] sm:$0xff]  ;;  %v342_v30 = vld [vmem:[%s3151_s1 + $0xa8] sm:$0xff]  ;;  %s283_s23 = scalar_lea.vmem [#allocation7], %s282_s19  ;;  %vm1499_vm5 = vcmask 73728  }
  0x3a   : > { %v297_v1 = vld [vmem:[%s287_s13] sm:$0xff]  ;;  %v1591_v26 = vld [vmem:[%s3151_s1 + $0x118] sm:$0xff]  ;;  %2124 = vmatpush3.bf16.msra.mxu1 %v2123_v16  ;;  %2094 = vmatprep.subr.bf16.mxu0 %v2093_v20  ;;  %v2095_v27 = vpack.c.bf16 %v324_v24, %v323_v22  ;;  %v2097_v32 = vpack.c.bf16 %v342_v30, %v341_v29  ;;  %v1609_v33 = vld [vmem:[%s3151_s1 + $0x1a8] sm:$0xff]  ;;  %s1514_s29 = sshll.u32 %s283_s23, 4  ;;  %s3108_s9 = scalar_lea.hbm %s3157_s7, %s1694_s22  ;;  %s3110_s29 = int_to_ptr.vmem [resolvable:$true] %s1514_s29 }
  0x3b   : > { %v312_v2 = vld [vmem:[%s287_s13 + $0x1] sm:$0x7f]  ;;  %299 = vrot.lane.b32.xlu0 %v297_v1, %s2481_s20  ;;  %v2127_v28 = vpack.c.bf16 %v1591_v26, %v1590_v25  ;;  %2126 = vmatprep.subr.bf16.mxu1 %v2125_v23  ;;  %v326_v35 = vld [vmem:[%s3151_s1 + $0x28] sm:$0xff]  ;;  %v343_v39 = vld [vmem:[%s3151_s1 + $0xb0] sm:$0xff]  ;;  %s1502_s14 = scalar_lea.sflag [#allocation6], %s282_s19  ;;  %s2409_s17 = scalar_lea.vmem %s3110_s29, 16 }
  0x3c   : > { %v304_v3 = vld [vmem:[%s287_s13] sm:$0x7f]  ;;  %314 = vrot.lane.b32.xlu1 %v312_v2, %s2481_s20  ;;  %v1593_v38 = vld [vmem:[%s3151_s1 + $0x128] sm:$0xff]  ;;  %v344_v41 = vld [vmem:[%s3151_s1 + $0xb8] sm:$0xff]  ;;  %p2410_p6 = scmp.ne.s32.totalorder %s3110_s29, %s2409_s17  ;;  %p3168_p9 = scmp.ne.s32.totalorder %s3161_s11, 0 }
  0x3d   : > { %v306_v4 = vrot.slane %v304_v3, 7  ;;  %v1608_v31 = vld [vmem:[%s3151_s1 + $0x1a0] sm:$0xff]  ;;  %2096 = vmatpush3.bf16.msra.mxu0 %v2095_v27  ;;  %v1610_v42 = vld [vmem:[%s3151_s1 + $0x1b0] sm:$0xff]  ;;  %v1611_v43 = vld [vmem:[%s3151_s1 + $0x1b8] sm:$0xff]  ;;  %v2101_v45 = vpack.c.bf16 %v344_v41, %v343_v39  ;;  %s2484_s28 = smov [#allocation7]  }
  0x3e   : > { %v325_v34 = vld [vmem:[%s3151_s1 + $0x20] sm:$0xff]  ;;  %v2129_v36 = vpack.c.bf16 %v1609_v33, %v1608_v31  ;;  %2128 = vmatpush3.bf16.msra.mxu1 %v2127_v28  ;;  %2098 = vmatprep.subr.bf16.mxu0 %v2097_v32  ;;  %v327_v46 = vld [vmem:[%s3151_s1 + $0x30] sm:$0xff]  ;;  %v328_v47 = vld [vmem:[%s3151_s1 + $0x38] sm:$0xff]  ;;  %v2133_v49 = vpack.c.bf16 %v1611_v43, %v1610_v42  ;;  %p2411_p10 = pnand %p2410_p6, %p3168_p9  ;;  %s2413_s16 = sshll.u32 %s2484_s28, 4  ;;  %s2414_s16 = int_to_ptr.vmem [resolvable:$false] %s2413_s16 }
  0x3f   : > { %292 = vrot.lane.b32.xlu0 %v297_v1, %s2481_s20  ;;  %v1592_v37 = vld [vmem:[%s3151_s1 + $0x120] sm:$0xff]  ;;  %v2099_v40 = vpack.c.bf16 %v326_v35, %v325_v34  ;;  %v1594_v48 = vld [vmem:[%s3151_s1 + $0x130] sm:$0xff]  ;;  %v1595_v50 = vld [vmem:[%s3151_s1 + $0x138] sm:$0xff]  ;;  %v2103_v55 = vpack.c.bf16 %v328_v47, %v327_v46  ;;  %s2415_s18 = scalar_lea.vmem %s2414_s16, 32  ;;  %p2416_p2 = scmp.lt.s32.totalorder %s3110_s29, %s2414_s16 }
  0x40   : > { %307 = vrot.lane.b32.xlu1 %v306_v4, %s2481_s20  ;;  %v2131_v44 = vpack.c.bf16 %v1593_v38, %v1592_v37  ;;  %2130 = vmatprep.subr.bf16.mxu1 %v2129_v36  ;;  %v345_v51 = vld [vmem:[%s3151_s1 + $0xc0] sm:$0xff]  ;;  %v346_v52 = vld [vmem:[%s3151_s1 + $0xc8] sm:$0xff]  ;;  %v2135_v56 = vpack.c.bf16 %v1595_v50, %v1594_v48  ;;  %v347_v63 = vld [vmem:[%s3151_s1 + $0xd0] sm:$0xff]  ;;  %p2412_p12 = pneg %p2411_p10  ;;  %p2417_p3 = scmp.lt.s32.totalorder %s2415_s18, %s2409_s17 }
  0x41   : > { %v1612_v53 = vld [vmem:[%s3151_s1 + $0x1c0] sm:$0xff]  ;;  %v1613_v54 = vld [vmem:[%s3151_s1 + $0x1c8] sm:$0xff]  ;;  %2100 = vmatpush3.bf16.msra.mxu0 %v2099_v40  ;;  %v2105_v57 = vpack.c.bf16 %v346_v52, %v345_v51  ;;  %v348_v1 = vld [vmem:[%s3151_s1 + $0xd8] sm:$0xff] }
  0x42   : > { %2132 = vmatpush3.bf16.msra.mxu1 %v2131_v44  ;;  %2102 = vmatprep.subr.bf16.mxu0 %v2101_v45  ;;  %v329_v58 = vld [vmem:[%s3151_s1 + $0x40] sm:$0xff]  ;;  %v330_v59 = vld [vmem:[%s3151_s1 + $0x48] sm:$0xff]  ;;  %v2137_v61 = vpack.c.bf16 %v1613_v54, %v1612_v53  ;;  %v1614_v2 = vld [vmem:[%s3151_s1 + $0x1d0] sm:$0xff]  ;;  %v2109_v6 = vpack.c.bf16 %v348_v1, %v347_v63  ;;  %p2418_p4 = por %p2417_p3, %p2416_p2 }
  0x43   : > { %v1596_v60 = vld [vmem:[%s3151_s1 + $0x140] sm:$0xff]  ;;  %2134 = vmatprep.subr.bf16.mxu1 %v2133_v49  ;;  %v1597_v62 = vld [vmem:[%s3151_s1 + $0x148] sm:$0xff]  ;;  %v1615_v3 = vld [vmem:[%s3151_s1 + $0x1d8] sm:$0xff]  ;;  %v2107_v4 = vpack.c.bf16 %v330_v59, %v329_v58 }
  0x44   : > { %v2139_v5 = vpack.c.bf16 %v1597_v62, %v1596_v60  ;;  %v331_v7 = vld [vmem:[%s3151_s1 + $0x50] sm:$0xff]  ;;  %v332_v8 = vld [vmem:[%s3151_s1 + $0x58] sm:$0xff]  ;;  %v2141_v10 = vpack.c.bf16 %v1615_v3, %v1614_v2  ;;  %v349_v12 = vld [vmem:[%s3151_s1 + $0xe0] sm:$0xff]  ;;  %p2419_p7 = pnand %p2418_p4, %p2412_p12 }
  0x45   : > { %2104 = vmatpush3.bf16.msra.mxu0 %v2103_v55  ;;  %v1598_v9 = vld [vmem:[%s3151_s1 + $0x150] sm:$0xff]  ;;  %v1599_v11 = vld [vmem:[%s3151_s1 + $0x158] sm:$0xff]  ;;  %v350_v13 = vld [vmem:[%s3151_s1 + $0xe8] sm:$0xff]  ;;  %v2111_v16 = vpack.c.bf16 %v332_v8, %v331_v7 }
  0x46   : > { %2136 = vmatpush3.bf16.msra.mxu1 %v2135_v56  ;;  %2106 = vmatprep.subr.bf16.mxu0 %v2105_v57  ;;  %v1616_v14 = vld [vmem:[%s3151_s1 + $0x1e0] sm:$0xff]  ;;  %v1617_v15 = vld [vmem:[%s3151_s1 + $0x1e8] sm:$0xff]  ;;  %v2143_v17 = vpack.c.bf16 %v1599_v11, %v1598_v9  ;;  %v2113_v18 = vpack.c.bf16 %v350_v13, %v349_v12  ;;  %v351_v24 = vld [vmem:[%s3151_s1 + $0xf0] sm:$0xff] }
  0x47   : > { %2138 = vmatprep.subr.bf16.mxu1 %v2137_v61  ;;  %v333_v19 = vld [vmem:[%s3151_s1 + $0x60] sm:$0xff]  ;;  %v334_v20 = vld [vmem:[%s3151_s1 + $0x68] sm:$0xff]  ;;  %v2145_v22 = vpack.c.bf16 %v1617_v15, %v1616_v14  ;;  %v352_v25 = vld [vmem:[%s3151_s1 + $0xf8] sm:$0xff] }
  0x48   : > { %v1600_v21 = vld [vmem:[%s3151_s1 + $0x160] sm:$0xff]  ;;  %v1601_v23 = vld [vmem:[%s3151_s1 + $0x168] sm:$0xff]  ;;  %v1618_v26 = vld [vmem:[%s3151_s1 + $0x1f0] sm:$0xff]  ;;  %v2115_v28 = vpack.c.bf16 %v334_v20, %v333_v19  ;;  %v2117_v30 = vpack.c.bf16 %v352_v25, %v351_v24 }
  0x49   : > { %2108 = vmatpush3.bf16.msra.mxu0 %v2107_v4  ;;  %v1619_v27 = vld [vmem:[%s3151_s1 + $0x1f8] sm:$0xff]  ;;  %v2147_v29 = vpack.c.bf16 %v1601_v23, %v1600_v21  ;;  %v335_v31 = vld [vmem:[%s3151_s1 + $0x70] sm:$0xff]  ;;  %v1636_v36 = vld [vmem:[%s3151_s1 + $0x280] sm:$0xff] }
  0x4a   : > { %2140 = vmatpush3.bf16.msra.mxu1 %v2139_v5  ;;  %2110 = vmatprep.subr.bf16.mxu0 %v2109_v6  ;;  %v336_v32 = vld [vmem:[%s3151_s1 + $0x78] sm:$0xff]  ;;  %v1602_v33 = vld [vmem:[%s3151_s1 + $0x170] sm:$0xff]  ;;  %v2149_v34 = vpack.c.bf16 %v1619_v27, %v1618_v26  ;;  %v1637_v37 = vld [vmem:[%s3151_s1 + $0x288] sm:$0xff] }
  0x4b   : > { %2142 = vmatprep.subr.bf16.mxu1 %v2141_v10  ;;  %v1603_v35 = vld [vmem:[%s3151_s1 + $0x178] sm:$0xff]  ;;  %v1668_v38 = vld [vmem:[%s3151_s1 + $0x380] sm:$0xff]  ;;  %v1669_v39 = vld [vmem:[%s3151_s1 + $0x388] sm:$0xff]  ;;  %v2119_v40 = vpack.c.bf16 %v336_v32, %v335_v31  ;;  %v2153_v42 = vpack.c.bf16 %v1637_v37, %v1636_v36 }
  0x4c   : > { %v2151_v41 = vpack.c.bf16 %v1603_v35, %v1602_v33  ;;  %v2185_v43 = vpack.c.bf16 %v1669_v39, %v1668_v38  ;;  %v1620_v48 = vld [vmem:[%s3151_s1 + $0x200] sm:$0xff]  ;;  %v1621_v49 = vld [vmem:[%s3151_s1 + $0x208] sm:$0xff]  ;;  %v1638_v53 = vld [vmem:[%s3151_s1 + $0x290] sm:$0xff] }
  0x4d   : > { %2112 = vmatpush3.bf16.msra.mxu0 %v2111_v16  ;;  %v1652_v50 = vld [vmem:[%s3151_s1 + $0x300] sm:$0xff]  ;;  %v1653_v51 = vld [vmem:[%s3151_s1 + $0x308] sm:$0xff]  ;;  %v1639_v54 = vld [vmem:[%s3151_s1 + $0x298] sm:$0xff]  ;;  %v2155_v57 = vpack.c.bf16 %v1621_v49, %v1620_v48 }
  0x4e   : > { %2144 = vmatpush3.bf16.msra.mxu1 %v2143_v17  ;;  %2114 = vmatprep.subr.bf16.mxu0 %v2113_v18  ;;  %v1670_v55 = vld [vmem:[%s3151_s1 + $0x390] sm:$0xff]  ;;  %v1671_v56 = vld [vmem:[%s3151_s1 + $0x398] sm:$0xff]  ;;  %v2187_v58 = vpack.c.bf16 %v1653_v51, %v1652_v50  ;;  %v1640_v63 = vld [vmem:[%s3151_s1 + $0x2a0] sm:$0xff]  ;;  %v2157_v3 = vpack.c.bf16 %v1639_v54, %v1638_v53 }
  0x4f   : > { %2146 = vmatprep.subr.bf16.mxu1 %v2145_v22  ;;  %v1622_v59 = vld [vmem:[%s3151_s1 + $0x210] sm:$0xff]  ;;  %v1623_v60 = vld [vmem:[%s3151_s1 + $0x218] sm:$0xff]  ;;  %v1641_v1 = vld [vmem:[%s3151_s1 + $0x2a8] sm:$0xff]  ;;  %v2189_v4 = vpack.c.bf16 %v1671_v56, %v1670_v55 }
  0x50   : > { %v1654_v61 = vld [vmem:[%s3151_s1 + $0x310] sm:$0xff]  ;;  %v1655_v62 = vld [vmem:[%s3151_s1 + $0x318] sm:$0xff]  ;;  %v1672_v5 = vld [vmem:[%s3151_s1 + $0x3a0] sm:$0xff]  ;;  %v2159_v7 = vpack.c.bf16 %v1623_v60, %v1622_v59  ;;  %v2161_v11 = vpack.c.bf16 %v1641_v1, %v1640_v63 }
  0x51   : > { %2116 = vmatpush3.bf16.msra.mxu0 %v2115_v28  ;;  %v1673_v6 = vld [vmem:[%s3151_s1 + $0x3a8] sm:$0xff]  ;;  %v2191_v8 = vpack.c.bf16 %v1655_v62, %v1654_v61  ;;  %v1624_v9 = vld [vmem:[%s3151_s1 + $0x220] sm:$0xff]  ;;  %v1642_v15 = vld [vmem:[%s3151_s1 + $0x2b0] sm:$0xff] }
  0x52   : > { %2148 = vmatpush3.bf16.msra.mxu1 %v2147_v29  ;;  %2118 = vmatprep.subr.bf16.mxu0 %v2117_v30  ;;  %v1625_v10 = vld [vmem:[%s3151_s1 + $0x228] sm:$0xff]  ;;  %v2193_v12 = vpack.c.bf16 %v1673_v6, %v1672_v5  ;;  %v1656_v13 = vld [vmem:[%s3151_s1 + $0x320] sm:$0xff]  ;;  %v1643_v16 = vld [vmem:[%s3151_s1 + $0x2b8] sm:$0xff] }
  0x53   : > { %2150 = vmatprep.subr.bf16.mxu1 %v2149_v34  ;;  %v1657_v14 = vld [vmem:[%s3151_s1 + $0x328] sm:$0xff]  ;;  %v1674_v17 = vld [vmem:[%s3151_s1 + $0x3b0] sm:$0xff]  ;;  %v1675_v18 = vld [vmem:[%s3151_s1 + $0x3b8] sm:$0xff]  ;;  %v2163_v19 = vpack.c.bf16 %v1625_v10, %v1624_v9  ;;  %v2165_v23 = vpack.c.bf16 %v1643_v16, %v1642_v15 }
  0x54   : > { %v2195_v20 = vpack.c.bf16 %v1657_v14, %v1656_v13  ;;  %v1626_v21 = vld [vmem:[%s3151_s1 + $0x230] sm:$0xff]  ;;  %v1627_v22 = vld [vmem:[%s3151_s1 + $0x238] sm:$0xff]  ;;  %v2197_v24 = vpack.c.bf16 %v1675_v18, %v1674_v17  ;;  %v1644_v27 = vld [vmem:[%s3151_s1 + $0x2c0] sm:$0xff] }
  0x55   : > { %2120 = vmatpush3.bf16.msra.mxu0 %v2119_v40  ;;  %v1658_v25 = vld [vmem:[%s3151_s1 + $0x330] sm:$0xff]  ;;  %v1659_v26 = vld [vmem:[%s3151_s1 + $0x338] sm:$0xff]  ;;  %v1645_v28 = vld [vmem:[%s3151_s1 + $0x2c8] sm:$0xff]  ;;  %v2167_v31 = vpack.c.bf16 %v1627_v22, %v1626_v21 }
  0x56   : > { %2152 = vmatpush3.bf16.msra.mxu1 %v2151_v41  ;;  %2154 = vmatprep.subr.bf16.mxu0 %v2153_v42  ;;  %v1676_v29 = vld [vmem:[%s3151_s1 + $0x3c0] sm:$0xff]  ;;  %v1677_v30 = vld [vmem:[%s3151_s1 + $0x3c8] sm:$0xff]  ;;  %v2199_v32 = vpack.c.bf16 %v1659_v26, %v1658_v25  ;;  %v2169_v35 = vpack.c.bf16 %v1645_v28, %v1644_v27  ;;  %v1646_v39 = vld [vmem:[%s3151_s1 + $0x2d0] sm:$0xff] }
  0x57   : > { %2186 = vmatprep.subr.bf16.mxu1 %v2185_v43  ;;  %v1628_v33 = vld [vmem:[%s3151_s1 + $0x240] sm:$0xff]  ;;  %v1629_v34 = vld [vmem:[%s3151_s1 + $0x248] sm:$0xff]  ;;  %v2201_v36 = vpack.c.bf16 %v1677_v30, %v1676_v29  ;;  %v1647_v40 = vld [vmem:[%s3151_s1 + $0x2d8] sm:$0xff] }
  0x58   : > { %v1660_v37 = vld [vmem:[%s3151_s1 + $0x340] sm:$0xff]  ;;  %v1661_v38 = vld [vmem:[%s3151_s1 + $0x348] sm:$0xff]  ;;  %v1678_v41 = vld [vmem:[%s3151_s1 + $0x3d0] sm:$0xff]  ;;  %v2171_v43 = vpack.c.bf16 %v1629_v34, %v1628_v33 }
  0x59   : > { %v1679_v42 = vld [vmem:[%s3151_s1 + $0x3d8] sm:$0xff]  ;;  %v1662_v49 = vld [vmem:[%s3151_s1 + $0x350] sm:$0xff]  ;;  %v1648_v51 = vld [vmem:[%s3151_s1 + $0x2e0] sm:$0xff] }
  0x5a   : > { %v2205_v48 = vpack.c.bf16 %v1679_v42, %v1678_v41  ;;  %v1663_v50 = vld [vmem:[%s3151_s1 + $0x358] sm:$0xff]  ;;  %v1680_v53 = vld [vmem:[%s3151_s1 + $0x3e0] sm:$0xff]  ;;  %v1681_v54 = vld [vmem:[%s3151_s1 + $0x3e8] sm:$0xff] }
  0x5b   : > { %v2207_v56 = vpack.c.bf16 %v1663_v50, %v1662_v49  ;;  %v2209_v60 = vpack.c.bf16 %v1681_v54, %v1680_v53  ;;  %v1664_v61 = vld [vmem:[%s3151_s1 + $0x360] sm:$0xff]  ;;  %v1665_v62 = vld [vmem:[%s3151_s1 + $0x368] sm:$0xff]  ;;  %v1650_v63 = vld [vmem:[%s3151_s1 + $0x2f0] sm:$0xff] }
  0x5c   : > { %v1651_v1 = vld [vmem:[%s3151_s1 + $0x2f8] sm:$0xff]  ;;  %v2211_v6 = vpack.c.bf16 %v1665_v62, %v1664_v61  ;;  %v757_v16 = vld [vmem:[#allocation4 + $0x48] sm:$0xff]  ;;  %v758_v22 = vld [vmem:[#allocation4 + $0x50] sm:$0xff] }
  0x5d   : > { %v1635_v10 = vld [vmem:[%s3151_s1 + $0x278] sm:$0xff]  ;;  %v749_v25 = vld [vmem:[#allocation4 + $0x18] sm:$0xff]  ;;  %v761_v28 = vld [vmem:[#allocation4 + $0x68] sm:$0xff] }
  0x5e   : > { %v756_v15 = vld [vmem:[#allocation4 + $0x40] sm:$0xff]  ;;  %v762_v33 = vld [vmem:[#allocation4 + $0x70] sm:$0xff]  ;;  %v763_v34 = vld [vmem:[#allocation4 + $0x78] sm:$0xff] }
  0x5f   : > { %v746_v17 = vld [vmem:[#allocation4] sm:$0xff]  ;;  %v2218_v18 = vpack.c.bf16 %v757_v16, %v756_v15  ;;  %v1684_v53 = vld [vmem:[%s3152_s2] ss:$0 sm:$0xff]  ;;  %v918_v15 = vld [vmem:[#allocation4 + $0xb0] sm:$0xff] }
  0x60   : > { %v760_v27 = vld [vmem:[#allocation4 + $0x60] sm:$0xff]  ;;  %v919_v16 = vld [vmem:[#allocation4 + $0xb8] sm:$0xff] }
  0x61   : > { %v750_v29 = vld [vmem:[#allocation4 + $0x20] sm:$0xff]  ;;  %v2224_v30 = vpack.c.bf16 %v761_v28, %v760_v27  ;;  %v1082_v27 = vld [vmem:[#allocation4 + $0x110] sm:$0xff]  ;;  %v1083_v28 = vld [vmem:[#allocation4 + $0x118] sm:$0xff] }
  0xad   : > { %v300_v44 = vpop.permute.xlu0 %299 }
  0xae   : > { %v315_v45 = vpop.permute.xlu1 %314  ;;  %303 = vst.msk [vmem:[#allocation2 + $0x8] sm:$0xff] %vm302_vm0, %v300_v44  ;;  %v2203_v44 = vpack.c.bf16 %v1661_v38, %v1660_v37  ;;  %v753_v37 = vld [vmem:[#allocation4 + $0x38] sm:$0xff] }
  0xaf   : > { %318 = vst.msk [vmem:[#allocation2 + $0x8] sm:$0x7f] %vm317_vm1, %v315_v45  ;;  %v1630_v45 = vld [vmem:[%s3151_s1 + $0x250] sm:$0xff] }
  0xb1   : > { %v293_v46 = vpop.permute.xlu0 %292 }
  0xb2   : > { %v308_v47 = vpop.permute.xlu1 %307  ;;  %296 = vst.msk [vmem:[#allocation2] sm:$0xff] %vm295_vm2, %v293_v46  ;;  %v1631_v46 = vld [vmem:[%s3151_s1 + $0x258] sm:$0xff] }
  0xb3   : > { %311 = vst.msk [vmem:[#allocation2] sm:$0xfe] %vm310_vm3, %v308_v47  ;;  %v2173_v47 = vpack.c.bf16 %v1647_v40, %v1646_v39  ;;  %v2175_v55 = vpack.c.bf16 %v1631_v46, %v1630_v45 }
  0xb6   : > { %v320_v52 = vld [vmem:[#allocation2 + $0x8] sm:$0xff] }
  0xb7   : > { %417 = vmatprep.mubr.f32.mxu0 %v320_v52  ;;  %520 = vmatprep.mubr.f32.mxu1 %v320_v52 }
  0xba   : > { %v2862_v2 = vld [vmem:[#allocation2] sm:$0xff] }
  0xbb   : > { %418 = vmatmul.mubr.f32.vlgmr.msra.gmra.mrb[0].mxu0 %v2862_v2  ;;  %521 = vmatmul.mubr.f32.vlgmr.msra.gmra.mrb[0].mxu1 %v2862_v2 }
  0xbc   : > { %2156 = vmatpush3.bf16.msra.mxu0 %v2155_v57  ;;  %2188 = vmatpush3.bf16.msra.mxu1 %v2187_v58  ;;  %v1632_v57 = vld [vmem:[%s3151_s1 + $0x260] sm:$0xff]  ;;  %v1633_v58 = vld [vmem:[%s3151_s1 + $0x268] sm:$0xff] }
  0xbd   : > { %623 = vmatprep.mubr.f32.mxu0 %v320_v52  ;;  %726 = vmatprep.mubr.f32.mxu1 %v320_v52  ;;  %v1649_v52 = vld [vmem:[%s3151_s1 + $0x2e8] sm:$0xff]  ;;  %v2179_v5 = vpack.c.bf16 %v1633_v58, %v1632_v57  ;;  %v912_v57 = vld [vmem:[#allocation4 + $0x80] sm:$0xff]  ;;  %v913_v58 = vld [vmem:[#allocation4 + $0x88] sm:$0xff] }
  0xbe   : > { %2158 = vmatprep.subr.bf16.mxu0 %v2157_v3  ;;  %2190 = vmatprep.subr.bf16.mxu1 %v2189_v4  ;;  %v2177_v59 = vpack.c.bf16 %v1649_v52, %v1648_v51  ;;  %v1682_v3 = vld [vmem:[%s3151_s1 + $0x3f0] sm:$0xff]  ;;  %v1683_v4 = vld [vmem:[%s3151_s1 + $0x3f8] sm:$0xff]  ;;  %v2242_v61 = vpack.c.bf16 %v913_v58, %v912_v57 }
  0xbf   : > { %v2213_v9 = vpack.c.bf16 %v1683_v4, %v1682_v3  ;;  %v998_v3 = vld [vmem:[#allocation4 + $0xd0] sm:$0xff]  ;;  %v999_v4 = vld [vmem:[#allocation4 + $0xd8] sm:$0xff] }
  0xc0   : > { %2160 = vmatpush3.bf16.msra.mxu0 %v2159_v7  ;;  %2192 = vmatpush3.bf16.msra.mxu1 %v2191_v8  ;;  %v1634_v7 = vld [vmem:[%s3151_s1 + $0x270] sm:$0xff]  ;;  %v2181_v8 = vpack.c.bf16 %v1651_v1, %v1650_v63  ;;  %v914_v63 = vld [vmem:[#allocation4 + $0x90] sm:$0xff] }
  0xc1   : > { %2162 = vmatprep.subr.bf16.mxu0 %v2161_v11  ;;  %2194 = vmatprep.subr.bf16.mxu1 %v2193_v12  ;;  %v1666_v11 = vld [vmem:[%s3151_s1 + $0x370] sm:$0xff]  ;;  %v1667_v12 = vld [vmem:[%s3151_s1 + $0x378] sm:$0xff]  ;;  %v2183_v13 = vpack.c.bf16 %v1635_v10, %v1634_v7  ;;  %v917_v10 = vld [vmem:[#allocation4 + $0xa8] sm:$0xff] }
  0xc2   : > { %v2215_v14 = vpack.c.bf16 %v1667_v12, %v1666_v11  ;;  %v915_v1 = vld [vmem:[#allocation4 + $0x98] sm:$0xff]  ;;  %v1000_v11 = vld [vmem:[#allocation4 + $0xe0] sm:$0xff]  ;;  %v1001_v12 = vld [vmem:[#allocation4 + $0xe8] sm:$0xff] }
  0xc3   : > { %v2245_v7 = vpack.c.bf16 %v915_v1, %v914_v63  ;;  %v1336_v63 = vld [vmem:[#allocation4 + $0x1e0] sm:$0xff]  ;;  %v1337_v1 = vld [vmem:[#allocation4 + $0x1e8] sm:$0xff] }
  0xc4   : > { %2164 = vmatpush3.bf16.msra.mxu0 %v2163_v19  ;;  %2196 = vmatpush3.bf16.msra.mxu1 %v2195_v20  ;;  %v747_v19 = vld [vmem:[#allocation4 + $0x8] sm:$0xff]  ;;  %v2482_v20 = vmov 0.0|0.0  }
  0xc5   : > { %2166 = vmatprep.subr.bf16.mxu0 %v2165_v23  ;;  %2198 = vmatprep.subr.bf16.mxu1 %v2197_v24  ;;  %v2230_v21 = vpack.c.bf16 %v747_v19, %v746_v17  ;;  %v759_v23 = vld [vmem:[#allocation4 + $0x58] sm:$0xff]  ;;  %v748_v24 = vld [vmem:[#allocation4 + $0x10] sm:$0xff]  ;;  %v2251_v19 = vpack.c.bf16 %v919_v16, %v918_v15 }
  0xc6   : > { %v2233_v26 = vpack.c.bf16 %v749_v25, %v748_v24  ;;  %v1002_v17 = vld [vmem:[#allocation4 + $0xf0] sm:$0xff]  ;;  %v1164_v24 = vld [vmem:[#allocation4 + $0x140] sm:$0xff]  ;;  %v1419_v15 = vld [vmem:[%s3155_s5 + $0x10] sm:$0xff] }
  0xc8   : > { %2168 = vmatpush3.bf16.msra.mxu0 %v2167_v31  ;;  %2200 = vmatpush3.bf16.msra.mxu1 %v2199_v32  ;;  %v751_v31 = vld [vmem:[#allocation4 + $0x28] sm:$0xff] }
  0xc9   : > { %2170 = vmatprep.subr.bf16.mxu0 %v2169_v35  ;;  %2202 = vmatprep.subr.bf16.mxu1 %v2201_v36  ;;  %v2236_v32 = vpack.c.bf16 %v751_v31, %v750_v29  ;;  %v752_v35 = vld [vmem:[#allocation4 + $0x30] sm:$0xff]  ;;  %v2227_v36 = vpack.c.bf16 %v763_v34, %v762_v33  ;;  %v2269_v33 = vpack.c.bf16 %v1083_v28, %v1082_v27 }
  0xca   : > { %v2239_v38 = vpack.c.bf16 %v753_v37, %v752_v35  ;;  %v1166_v29 = vld [vmem:[#allocation4 + $0x150] sm:$0xff]  ;;  %v1084_v35 = vld [vmem:[#allocation4 + $0x120] sm:$0xff] }
  0xcb   : > { %v1168_v37 = vld [vmem:[#allocation4 + $0x160] sm:$0xff] }
  0xcc   : > { %2172 = vmatpush3.bf16.msra.mxu0 %v2171_v43  ;;  %2204 = vmatpush3.bf16.msra.mxu1 %v2203_v44 }
  0xcd   : > { %2174 = vmatprep.subr.bf16.mxu0 %v2173_v47  ;;  %2206 = vmatprep.subr.bf16.mxu1 %v2205_v48 }
  0xd0   : > { %2176 = vmatpush3.bf16.msra.mxu0 %v2175_v55  ;;  %2208 = vmatpush3.bf16.msra.mxu1 %v2207_v56 }
  0xd1   : > { %2178 = vmatprep.subr.bf16.mxu0 %v2177_v59  ;;  %2210 = vmatprep.subr.bf16.mxu1 %v2209_v60  ;;  %v996_v59 = vld [vmem:[#allocation4 + $0xc0] sm:$0xff]  ;;  %v997_v60 = vld [vmem:[#allocation4 + $0xc8] sm:$0xff] }
  0xd2   : > { %v2254_v62 = vpack.c.bf16 %v997_v60, %v996_v59 }
  0xd4   : > { %2180 = vmatpush3.bf16.msra.mxu0 %v2179_v5  ;;  %2212 = vmatpush3.bf16.msra.mxu1 %v2211_v6 }
  0xd5   : > { %2182 = vmatprep.subr.bf16.mxu0 %v2181_v8  ;;  %2214 = vmatprep.subr.bf16.mxu1 %v2213_v9  ;;  %v2257_v8 = vpack.c.bf16 %v999_v4, %v998_v3  ;;  %v916_v9 = vld [vmem:[#allocation4 + $0xa0] sm:$0xff]  ;;  %v2308_v4 = vpack.c.bf16 %v1337_v1, %v1336_v63 }
  0xd8   : > { %2184 = vmatpush3.bf16.msra.mxu0 %v2183_v13  ;;  %2216 = vmatpush3.bf16.msra.mxu1 %v2215_v14  ;;  %v2248_v13 = vpack.c.bf16 %v917_v10, %v916_v9  ;;  %v2260_v14 = vpack.c.bf16 %v1001_v12, %v1000_v11 }
  0xd9   : > { %2217 = vmatprep.subr.bf16.mxu0 %v2482_v20  ;;  %2229 = vmatprep.subr.bf16.mxu1 %v2482_v20 }
  0xdb   : > { %624 = vmatmul.mubr.f32.vlgmr.msra.gmra.mrb[2].mxu0 %v2862_v2  ;;  %727 = vmatmul.mubr.f32.vlgmr.msra.gmra.mrb[2].mxu1 %v2862_v2  ;;  %v2221_v2 = vpack.c.bf16 %v759_v23, %v758_v22  ;;  %v1080_v22 = vld [vmem:[#allocation4 + $0x100] sm:$0xff]  ;;  %v1081_v23 = vld [vmem:[#allocation4 + $0x108] sm:$0xff] }
  0xdc   : > { %2219 = vmatpush3.bf16.msra.mxu0 %v2218_v18  ;;  %2231 = vmatpush3.bf16.msra.mxu1 %v2230_v21  ;;  %v1003_v18 = vld [vmem:[#allocation4 + $0xf8] sm:$0xff]  ;;  %v2266_v25 = vpack.c.bf16 %v1081_v23, %v1080_v22  ;;  %v1424_v23 = vld [vmem:[%s3155_s5 + $0x38] sm:$0xff] }
  0xdd   : > { %2220 = vmatprep.subr.bf16.mxu0 %v2482_v20  ;;  %2232 = vmatprep.subr.bf16.mxu1 %v2482_v20  ;;  %v2263_v21 = vpack.c.bf16 %v1003_v18, %v1002_v17  ;;  %v1420_v17 = vld [vmem:[%s3155_s5 + $0x18] sm:$0xff]  ;;  %v1423_v22 = vld [vmem:[%s3155_s5 + $0x30] sm:$0xff] }
  0xde   : > { %1934 = vmatprep.mubr.msk.f32.mxu0 %vm2483_vm4, %v2480_v0  ;;  %1953 = vmatprep.mubr.msk.f32.mxu1 %vm2483_vm4, %v2480_v0  ;;  %v2317_v18 = vpack.c.bf16 %v1420_v17, %v1419_v15 }
  0xe0   : > { %2222 = vmatpush3.bf16.msra.mxu0 %v2221_v2  ;;  %2234 = vmatpush3.bf16.msra.mxu1 %v2233_v26  ;;  %v1165_v2 = vld [vmem:[#allocation4 + $0x148] sm:$0xff] }
  0xe1   : > { %2223 = vmatprep.subr.bf16.mxu0 %v2482_v20  ;;  %2235 = vmatprep.subr.bf16.mxu1 %v2482_v20  ;;  %v2278_v26 = vpack.c.bf16 %v1165_v2, %v1164_v24  ;;  %v2323_v24 = vpack.c.bf16 %v1424_v23, %v1423_v22 }
  0xe4   : > { %2225 = vmatpush3.bf16.msra.mxu0 %v2224_v30  ;;  %2237 = vmatpush3.bf16.msra.mxu1 %v2236_v32  ;;  %v1167_v30 = vld [vmem:[#allocation4 + $0x158] sm:$0xff] }
  0xe5   : > { %2226 = vmatprep.subr.bf16.mxu0 %v2482_v20  ;;  %2238 = vmatprep.subr.bf16.mxu1 %v2482_v20  ;;  %v2281_v34 = vpack.c.bf16 %v1167_v30, %v1166_v29 }
  0xe8   : > { %2228 = vmatpush3.bf16.msra.mxu0 %v2227_v36  ;;  %2240 = vmatpush3.bf16.msra.mxu1 %v2239_v38  ;;  %v1085_v36 = vld [vmem:[#allocation4 + $0x128] sm:$0xff] }
  0xe9   : > { %2241 = vmatprep.subr.bf16.mxu0 %v2482_v20  ;;  %2253 = vmatprep.subr.bf16.mxu1 %v2482_v20  ;;  %v1169_v38 = vld [vmem:[#allocation4 + $0x168] sm:$0xff] }
 0x18e   : > { %v1729_v39 = vpop.f32.mrb[0].mxu0  ;;  %v1764_v40 = vpop.f32.mrb[0].mxu1 }
 0x18f   : > { %v1730_v41 = vpop.f32.mrb[1].mxu0  ;;  %v1765_v42 = vpop.f32.mrb[1].mxu1 }
 0x190   : > { %v1731_v43 = vadd.f32 %v1730_v41, %v1729_v39  ;;  %v1766_v44 = vadd.f32 %v1765_v42, %v1764_v40  ;;  %v2272_v39 = vpack.c.bf16 %v1085_v36, %v1084_v35  ;;  %v2284_v40 = vpack.c.bf16 %v1169_v38, %v1168_v37  ;;  %v1086_v41 = vld [vmem:[#allocation4 + $0x130] sm:$0xff]  ;;  %v1087_v42 = vld [vmem:[#allocation4 + $0x138] sm:$0xff] }
 0x192   : > { %v732_v45 = vmax.f32 %v1731_v43, %v1766_v44  ;;  %v1170_v43 = vld [vmem:[#allocation4 + $0x170] sm:$0xff]  ;;  %v1171_v44 = vld [vmem:[#allocation4 + $0x178] sm:$0xff] }
 0x1ae   : > { %v1799_v46 = vpop.f32.mrb[2].mxu0  ;;  %v1834_v47 = vpop.f32.mrb[2].mxu1 }
 0x1af   : > { %v1800_v48 = vpop.f32.mrb[3].mxu0  ;;  %v1835_v49 = vpop.f32.mrb[3].mxu1 }
 0x1b0   : > { %v1801_v50 = vadd.f32 %v1800_v48, %v1799_v46  ;;  %v1836_v51 = vadd.f32 %v1835_v49, %v1834_v47  ;;  %v2287_v46 = vpack.c.bf16 %v1171_v44, %v1170_v43  ;;  %v1248_v47 = vld [vmem:[#allocation4 + $0x180] sm:$0xff]  ;;  %v1249_v48 = vld [vmem:[#allocation4 + $0x188] sm:$0xff] }
 0x1b1   : > { %v1332_v49 = vld [vmem:[#allocation4 + $0x1c0] sm:$0xff] }
 0x1b2   : > { %v733_v52 = vmax.f32 %v1801_v50, %v1836_v51  ;;  %v1333_v50 = vld [vmem:[#allocation4 + $0x1c8] sm:$0xff]  ;;  %v2290_v51 = vpack.c.bf16 %v1249_v48, %v1248_v47 }
 0x1b4   : > { %v734_v54 = vmax.f32 %v732_v45, %v733_v52  ;;  %v2275_v45 = vpack.c.bf16 %v1087_v42, %v1086_v41  ;;  %v2302_v52 = vpack.c.bf16 %v1333_v50, %v1332_v49  ;;  %v1425_v49 = vld [vmem:[%s3156_s6] sm:$0x1] }
 0x1b6   : > { %v742_v55 = vadd.f32 %v1684_v53, %v734_v54  ;;  %v1250_v53 = vld [vmem:[#allocation4 + $0x190] sm:$0xff]  ;;  %v1251_v54 = vld [vmem:[#allocation4 + $0x198] sm:$0xff] }
 0x1b7   : > { %v2293_v59 = vpack.c.bf16 %v1251_v54, %v1250_v53 }
 0x1b8   : > { %v743_v56 = vmax.f32 %v742_v55, 0.0  ;;  %v1334_v55 = vld [vmem:[#allocation4 + $0x1d0] sm:$0xff] }
 0x1ba   : > { %744 = vst.msk [vmem:[#allocation3] sm:$0xff] %vm302_vm0, %v743_v56  ;;  %v1335_v56 = vld [vmem:[#allocation4 + $0x1d8] sm:$0xff] }
 0x1bb   : > { %v2305_v60 = vpack.c.bf16 %v1335_v56, %v1334_v55 }
 0x1c1   : > { %v754_v5 = vld [vmem:[#allocation3 + $0x1] sm:$0x1]  ;;  %v745_v6 = vld [vmem:[#allocation3] sm:$0x1]  ;;  %v910_v31 = vld [vmem:[#allocation3 + $0x2] sm:$0x1] }
 0x1c2   : > { %1935 = vmatmul.mubr.msk.f32.vlgmr.msra.gmra.mrb[4].mxu0 %vm302_vm0, %v754_v5  ;;  %1954 = vmatmul.mubr.msk.f32.vlgmr.msra.gmra.mrb[4].mxu1 %vm302_vm0, %v745_v6  ;;  %v994_v32 = vld [vmem:[#allocation3 + $0x3] sm:$0x1]  ;;  %v1078_v57 = vld [vmem:[#allocation3 + $0x4] sm:$0x1]  ;;  %v1162_v58 = vld [vmem:[#allocation3 + $0x5] sm:$0x1] }
 0x1c3   : > { %2243 = vmatpush3.bf16.msra.mxu0 %v2242_v61  ;;  %2255 = vmatpush3.bf16.msra.mxu1 %v2254_v62  ;;  %v1252_v61 = vld [vmem:[#allocation4 + $0x1a0] sm:$0xff]  ;;  %v1253_v62 = vld [vmem:[#allocation4 + $0x1a8] sm:$0xff]  ;;  %v1254_v5 = vld [vmem:[#allocation4 + $0x1b0] sm:$0xff] }
 0x1c4   : > { %2244 = vmatprep.subr.bf16.mxu0 %v2482_v20  ;;  %2256 = vmatprep.subr.bf16.mxu1 %v2482_v20  ;;  %v2296_v3 = vpack.c.bf16 %v1253_v62, %v1252_v61  ;;  %v1255_v6 = vld [vmem:[#allocation4 + $0x1b8] sm:$0xff] }
 0x1c5   : > { %1972 = vmatprep.mubr.msk.f32.mxu0 %vm2483_vm4, %v2480_v0  ;;  %1991 = vmatprep.mubr.msk.f32.mxu1 %vm2483_vm4, %v2480_v0  ;;  %v2299_v9 = vpack.c.bf16 %v1255_v6, %v1254_v5  ;;  %v1246_v11 = vld [vmem:[#allocation3 + $0x6] sm:$0x1]  ;;  %v1330_v12 = vld [vmem:[#allocation3 + $0x7] sm:$0x1] }
 0x1c7   : > { %2246 = vmatpush3.bf16.msra.mxu0 %v2245_v7  ;;  %2258 = vmatpush3.bf16.msra.mxu1 %v2257_v8  ;;  %v1338_v7 = vld [vmem:[#allocation4 + $0x1f0] sm:$0xff]  ;;  %v1339_v8 = vld [vmem:[#allocation4 + $0x1f8] sm:$0xff] }
 0x1c8   : > { %2247 = vmatprep.subr.bf16.mxu0 %v2482_v20  ;;  %2259 = vmatprep.subr.bf16.mxu1 %v2482_v20  ;;  %v2311_v10 = vpack.c.bf16 %v1339_v8, %v1338_v7 }
 0x1cb   : > { %2249 = vmatpush3.bf16.msra.mxu0 %v2248_v13  ;;  %2261 = vmatpush3.bf16.msra.mxu1 %v2260_v14  ;;  %v1417_v13 = vld [vmem:[%s3155_s5] sm:$0xff]  ;;  %v1418_v14 = vld [vmem:[%s3155_s5 + $0x8] sm:$0xff] }
 0x1cc   : > { %2250 = vmatprep.subr.bf16.mxu0 %v2482_v20  ;;  %2262 = vmatprep.subr.bf16.mxu1 %v2482_v20  ;;  %v2314_v16 = vpack.c.bf16 %v1418_v14, %v1417_v13 }
 0x1cf   : > { %2252 = vmatpush3.bf16.msra.mxu0 %v2251_v19  ;;  %2264 = vmatpush3.bf16.msra.mxu1 %v2263_v21  ;;  %v1422_v19 = vld [vmem:[%s3155_s5 + $0x28] sm:$0xff] }
 0x1d0   : > { %2265 = vmatprep.subr.bf16.mxu0 %v2482_v20  ;;  %2277 = vmatprep.subr.bf16.mxu1 %v2482_v20 }
 0x1d2   : > { %1973 = vmatmul.mubr.msk.f32.vlgmr.msra.gmra.mrb[6].mxu0 %vm302_vm0, %v910_v31  ;;  %1992 = vmatmul.mubr.msk.f32.vlgmr.msra.gmra.mrb[6].mxu1 %vm302_vm0, %v994_v32 }
 0x1d3   : > { %2267 = vmatpush3.bf16.msra.mxu0 %v2266_v25  ;;  %2279 = vmatpush3.bf16.msra.mxu1 %v2278_v26 }
 0x1d4   : > { %2268 = vmatprep.subr.bf16.mxu0 %v2482_v20  ;;  %2280 = vmatprep.subr.bf16.mxu1 %v2482_v20 }
 0x1d5   : > { %2010 = vmatprep.mubr.msk.f32.mxu0 %vm2483_vm4, %v2480_v0  ;;  %2029 = vmatprep.mubr.msk.f32.mxu1 %vm2483_vm4, %v2480_v0 }
 0x1d7   : > { %2270 = vmatpush3.bf16.msra.mxu0 %v2269_v33  ;;  %2282 = vmatpush3.bf16.msra.mxu1 %v2281_v34 }
 0x1d8   : > { %2271 = vmatprep.subr.bf16.mxu0 %v2482_v20  ;;  %2283 = vmatprep.subr.bf16.mxu1 %v2482_v20 }
 0x1db   : > { %2273 = vmatpush3.bf16.msra.mxu0 %v2272_v39  ;;  %2285 = vmatpush3.bf16.msra.mxu1 %v2284_v40 }
 0x1dc   : > { %2274 = vmatprep.subr.bf16.mxu0 %v2482_v20  ;;  %2286 = vmatprep.subr.bf16.mxu1 %v2482_v20 }
 0x1df   : > { %2276 = vmatpush3.bf16.msra.mxu0 %v2275_v45  ;;  %2288 = vmatpush3.bf16.msra.mxu1 %v2287_v46  ;;  %v1414_v45 = vld [vmem:[%s3154_s4] sm:$0x1] }
 0x1e0   : > { %2289 = vmatprep.subr.bf16.mxu0 %v2482_v20  ;;  %2301 = vmatprep.subr.bf16.mxu1 %v2482_v20 }
 0x1e2   : > { %2011 = vmatmul.mubr.msk.f32.vlgmr.msra.gmra.mrb[8].mxu0 %vm302_vm0, %v1078_v57  ;;  %2030 = vmatmul.mubr.msk.f32.vlgmr.msra.gmra.mrb[8].mxu1 %vm302_vm0, %v1162_v58 }
 0x1e3   : > { %2291 = vmatpush3.bf16.msra.mxu0 %v2290_v51  ;;  %2303 = vmatpush3.bf16.msra.mxu1 %v2302_v52 }
 0x1e4   : > { %2292 = vmatprep.subr.bf16.mxu0 %v2482_v20  ;;  %2304 = vmatprep.subr.bf16.mxu1 %v2482_v20 }
 0x1e5   : > { %2048 = vmatprep.mubr.msk.f32.mxu0 %vm2483_vm4, %v2480_v0  ;;  %2067 = vmatprep.mubr.msk.f32.mxu1 %vm2483_vm4, %v2480_v0 }
 0x1e7   : > { %2294 = vmatpush3.bf16.msra.mxu0 %v2293_v59  ;;  %2306 = vmatpush3.bf16.msra.mxu1 %v2305_v60 }
 0x1e8   : > { %2295 = vmatprep.subr.bf16.mxu0 %v2482_v20  ;;  %2307 = vmatprep.subr.bf16.mxu1 %v2482_v20 }
 0x1eb   : > { %2297 = vmatpush3.bf16.msra.mxu0 %v2296_v3  ;;  %2309 = vmatpush3.bf16.msra.mxu1 %v2308_v4 }
 0x1ec   : > { %2298 = vmatprep.subr.bf16.mxu0 %v2482_v20  ;;  %2310 = vmatprep.subr.bf16.mxu1 %v2482_v20 }
 0x1ef   : > { %2300 = vmatpush3.bf16.msra.mxu0 %v2299_v9  ;;  %2312 = vmatpush3.bf16.msra.mxu1 %v2311_v10 }
 0x1f0   : > { %2313 = vmatprep.subr.bf16.mxu0 %v2482_v20 }
 0x1f2   : > { %2049 = vmatmul.mubr.msk.f32.vlgmr.msra.gmra.mrb[10].mxu0 %vm302_vm0, %v1246_v11  ;;  %2068 = vmatmul.mubr.msk.f32.vlgmr.msra.gmra.mrb[10].mxu1 %vm302_vm0, %v1330_v12 }
 0x1f3   : > { %2086 = vmatprep.mubr.msk.f32.mxu0 %vm2483_vm4, %v2480_v0  ;;  %2315 = vmatpush3.bf16.msra.mxu0 %v2314_v16  ;;  %v1421_v0 = vld [vmem:[%s3155_s5 + $0x20] sm:$0xff] }
 0x1f4   : > { %2316 = vmatprep.subr.bf16.mxu0 %v2482_v20  ;;  %v2320_v21 = vpack.c.bf16 %v1422_v19, %v1421_v0 }
 0x1f7   : > { %2318 = vmatpush3.bf16.msra.mxu0 %v2317_v18 }
 0x1f8   : > { %2319 = vmatprep.subr.bf16.mxu0 %v2482_v20 }
 0x1fb   : > { %2321 = vmatpush3.bf16.msra.mxu0 %v2320_v21 }
 0x1fc   : > { %2322 = vmatprep.subr.bf16.mxu0 %v2482_v20 }
 0x1ff   : > { %2324 = vmatpush3.bf16.msra.mxu0 %v2323_v24 }
 0x295   : > { %v833_v2 = vpop.f32.mrb[4].mxu0  ;;  %v906_v25 = vpop.f32.mrb[4].mxu1 }
 0x296   : > { %v907_v26 = vadd.f32 %v906_v25, %v833_v2  ;;  %v1936_v27 = vpop.f32.mrb[5].mxu0  ;;  %v1955_v28 = vpop.f32.mrb[5].mxu1 }
 0x2a5   : > { %v989_v29 = vpop.f32.mrb[6].mxu0  ;;  %v1073_v30 = vpop.f32.mrb[6].mxu1 }
 0x2a6   : > { %v993_v31 = vadd.f32 %v989_v29, %v907_v26  ;;  %v1974_v32 = vpop.f32.mrb[7].mxu0  ;;  %v1993_v20 = vpop.f32.mrb[7].mxu1 }
 0x2a8   : > { %v1077_v33 = vadd.f32 %v1073_v30, %v993_v31 }
 0x2b5   : > { %v1157_v34 = vpop.f32.mrb[8].mxu0  ;;  %v1241_v35 = vpop.f32.mrb[8].mxu1 }
 0x2b6   : > { %v1161_v36 = vadd.f32 %v1157_v34, %v1077_v33  ;;  %v2012_v37 = vpop.f32.mrb[9].mxu0  ;;  %v2031_v38 = vpop.f32.mrb[9].mxu1 }
 0x2b8   : > { %v1245_v39 = vadd.f32 %v1241_v35, %v1161_v36 }
 0x2c5   : > { %v1325_v40 = vpop.f32.mrb[10].mxu0  ;;  %v1409_v41 = vpop.f32.mrb[10].mxu1 }
 0x2c6   : > { %v1329_v42 = vadd.f32 %v1325_v40, %v1245_v39  ;;  %v2050_v43 = vpop.f32.mrb[11].mxu0  ;;  %v2069_v44 = vpop.f32.mrb[11].mxu1 }
 0x2c8   : > { %v1413_v46 = vadd.f32 %v1409_v41, %v1329_v42 }
 0x2ca   : > { %v1415_v47 = vadd.f32 %v1414_v45, %v1413_v46 }
 0x2cc   : > { %v1416_v48 = vmax.f32 %v1415_v47, 0.0 }
 0x2ce   : > { %2087 = vmatmul.mubr.msk.f32.vlgmr.msra.gmra.mrb[12].mxu0 %vm302_vm0, %v1416_v48 }
 0x3a1   : > { %v1495_v50 = vpop.f32.mrb[12].mxu0 }
 0x3a2   : > { %v1496_v51 = vadd.f32 %v1495_v50, %v1425_v49  ;;  %v2088_v52 = vpop.f32.mrb[13].mxu0 }
 0x3a4   : > { %1500 = vst.msk [vmem:[%s283_s23] sm:$0x1] %vm1499_vm5, %v1496_v51 }
 0x3a5   : > { %2422 = shalt.err (!%p2419_p7)
}
 0x3a6   : > { %s2423_s15 = scalar_lea.hbm %s3108_s9, 16  ;;  %s2427_s21 = scalar_lea.hbm %s3157_s7, 32 }
 0x3a7   : > { %p2424_p8 = scmp.ne.s32.totalorder %s3108_s9, %s2423_s15  ;;  %p2428_p1 = scmp.lt.u32.totalorder %s3108_s9, %s3157_s7 }
 0x3a8   : > { %p2429_p0 = scmp.lt.u32.totalorder %s2427_s21, %s2423_s15  ;;  %p2431_p6 = scmp.lt.u32.totalorder %s2423_s15, %s3108_s9 }
 0x3a9   : > { %p2425_p11 = pnand %p2424_p8, %p3168_p9 }
 0x3aa   : > { %p2430_p5 = por %p2429_p0, %p2428_p1 }
 0x3ab   : > { %p2426_p13 = pneg %p2425_p11 }
 0x3ac   : > { %p2432_p10 = por %p2431_p6, %p2430_p5 }
 0x3ae   : > { %p2433_p12 = pnand %p2432_p10, %p2426_p13 }
 0x3b0   : > { %2436 = shalt.err (!%p2433_p12)
}
 0x3b1   : > { %2329 = dma.vmem_to_hbm [thread:$0]  (%p3168_p9), %s3110_s29, 16, %s3108_s9, %s1502_s14  }
 0x3b2 PF: > { %p2341_p2 = scmp.ge.s32.totalorder %s2475_s27, 2  ;;  %s1526_s20 = sand.u32 1, %s2463_s24  }
 0x3b3   : > { %p3169_p3 = scmp.ne.s32.totalorder %s3162_s12, 0  ;;  %s1527_s8 = scalar_lea.sflag [#allocation6], %s1526_s20 }
 0x3b5   : > { %p2336_p4 = pnand %p2341_p2, %p3169_p3 }
 0x3b7   : > { %2458 = dma.done.wait (!%p2336_p4), %s1527_s8, 16  }
 0x3b8   : > { %2460 = vsyncadd (!%p2336_p4), %s1527_s8, 4294967280  ;;  %p18_p7 = scmp.ge.s32.totalorder %s2550_s30, 4   ;;  %s3170_s24 = smov %s2467_s25 }
 0x3b9   : > { %s3171_s25 = smov %s2471_s26  ;;  %s3172_s26 = smov %s2561_s10 }
 0x3ba   : > { %s3173_s27 = smov %s2550_s30  ;;  %20 = sbr.rel (!%p18_p7) target bundleno = 4 (0x4), region = 98 }
 0x3c1   :  { %1531 = vsyncpa [#allocation5], 1 }
 0x3c2   :  { %1533 = vsyncpa [#allocation5 + $0x1], 1 }
 0x3c3   :  { %1534 = vsyncpa [#allocation6], 1 }
 0x3c4   :  { %1536 = vsyncpa [#allocation6 + $0x1], 1 }

</bundles_post_ra>
